<compile_context>
chip_gen: v7x
topology: tpu7x:2x2x1
jax: 0.10.0
libtpu: 0.0.40
codegen_flags: <defaults>
</compile_context>

<pallas_src>
import numpy as np
import jax
import jax.numpy as jnp
from jax import lax
from jax.experimental import pallas as pl
from jax.experimental.pallas import tpu as pltpu

# Keep XLA-side reference matmuls in full f32 so the correctness check is tight.
jax.config.update("jax_default_matmul_precision", "highest")


def tgcn_kernel(emb_ref, t_ref, nt_ref, x_ref, w_ref, b_ref, o_ref):
    # emb_ref: (N, E)        node embeddings                  (resident)
    # t_ref:   (1, 1, T)     t[b]
    # nt_ref:  (1, 1, T)     n_t[b]
    # x_ref:   (1, N, C)     x[b]
    # w_ref:   (D*K*C, O)    weights_pool.reshape(D*K*C, O)   (resident)
    # b_ref:   (D, O)        bias_pool                        (resident)
    # o_ref:   (1, N, O)     output[b]
    N, E = emb_ref.shape
    D, O = b_ref.shape
    C = x_ref.shape[-1]
    T = t_ref.shape[-1]
    KC = w_ref.shape[0] // D
    K = KC // C

    emb = emb_ref[...]          # (N, E)
    x_b = x_ref[0]              # (N, C)
    t_b = t_ref[0]              # (1, T)
    nt_b = nt_ref[0]            # (1, T)

    # a = emb @ emb.T (contract the embedding dim of both operands).
    a = lax.dot_general(emb, emb, (((1,), (1,)), ((), ())),
                        preferred_element_type=jnp.float32)            # (N, N)
    # a_t = <n_t[b], t[b]>  (the bmm of (1,T) x (T,1)), kept 2-D for broadcast.
    a_t = jnp.sum(nt_b * t_b, axis=-1, keepdims=True)                  # (1, 1)
    _a = a + a_t

    # A = softmax(relu(_a), axis=-1) — numerically-stable form.
    r = jnp.maximum(_a, 0.0)
    m = jnp.max(r, axis=-1, keepdims=True)
    e = jnp.exp(r - m)
    A = e / jnp.sum(e, axis=-1, keepdims=True)                          # (N, N)

    # Identity via 2-D iota compare (Pallas-TPU friendly).
    row = lax.broadcasted_iota(jnp.int32, (N, N), 0)
    col = lax.broadcasted_iota(jnp.int32, (N, N), 1)
    eye = (row == col).astype(jnp.float32)

    # Chebyshev support set: [I, A, 2*A*S_{k-1} - S_{k-2}, ...]  (K is static).
    supports = [eye, A]
    for _ in range(2, K):
        supports.append(
            2.0 * jnp.dot(A, supports[-1], preferred_element_type=jnp.float32)
            - supports[-2])

    # x_g[b] with the (k, i) pair flattened k-major: (N, K*C).
    xg = jnp.concatenate(
        [jnp.dot(S, x_b, preferred_element_type=jnp.float32) for S in supports],
        axis=-1)

    # Per-batch node embedding with n_t appended: (N, D), D = E + T.
    nemb = jnp.concatenate([emb, jnp.broadcast_to(nt_b, (N, T))], axis=-1)

    # Z[n, d*K*C + k*C + i] = nemb[n, d] * x_g[n, k, i]  (d-major, matches W_flat).
    z = jnp.concatenate([nemb[:, d:d + 1] * xg for d in range(D)], axis=-1)  # (N, D*K*C)

    out = (jnp.dot(z, w_ref[...], preferred_element_type=jnp.float32)
           + jnp.dot(nemb, b_ref[...], preferred_element_type=jnp.float32))  # (N, O)
    o_ref[0] = out.astype(o_ref.dtype)


def tgcn_forward(x, node_embeddings_tuple, weights_pool, bias_pool, *,
                 cheb_k, period=False):
    """x: [bs, N, in_dim]; node_embeddings_tuple = (node_emb[N,E], t[bs,T], n_t[bs,T], p).

    Returns x_gconv: [bs, N, out_dim] (float32). Only period=False is supported.
    """
    if period:
        # TODO(synk): dynamic_topK (random noise + topk + scatter) not implemented.
        raise NotImplementedError("period=True path (dynamic_topK) is not implemented")

    node_emb, t, n_t, _p = node_embeddings_tuple
    bs, N, C = x.shape
    E = node_emb.shape[-1]
    T = t.shape[-1]
    D, K, Ci, O = weights_pool.shape
    assert K == cheb_k and Ci == C and D == E + T and bias_pool.shape == (D, O)

    KC = K * C
    x = x.astype(jnp.float32)
    emb = node_emb.astype(jnp.float32)
    t3 = t.astype(jnp.float32).reshape(bs, 1, T)
    nt3 = n_t.astype(jnp.float32).reshape(bs, 1, T)
    w_flat = weights_pool.astype(jnp.float32).reshape(D * KC, O)   # (d,k,i) d-major
    b_pool = bias_pool.astype(jnp.float32)

    return pl.pallas_call(
        tgcn_kernel,
        out_shape=jax.ShapeDtypeStruct((bs, N, O), jnp.float32),
        grid_spec=pltpu.PrefetchScalarGridSpec(
            num_scalar_prefetch=0,
            grid=(bs,),
            in_specs=[
                pl.BlockSpec((N, E), lambda b: (0, 0)),            # node emb (resident)
                pl.BlockSpec((1, 1, T), lambda b: (b, 0, 0)),      # t[b]
                pl.BlockSpec((1, 1, T), lambda b: (b, 0, 0)),      # n_t[b]
                pl.BlockSpec((1, N, C), lambda b: (b, 0, 0)),      # x[b]
                pl.BlockSpec((D * KC, O), lambda b: (0, 0)),       # W_flat (resident)
                pl.BlockSpec((D, O), lambda b: (0, 0)),            # bias_pool (resident)
            ],
            out_specs=pl.BlockSpec((1, N, O), lambda b: (b, 0, 0)),
        ),
        compiler_params=pltpu.CompilerParams(
            dimension_semantics=("parallel",),   # independent batches -> both TCs on v7x
        ),
    )(emb, t3, nt3, x, w_flat, b_pool)


def tgcn_reference(x, node_embeddings_tuple, weights_pool, bias_pool, *, cheb_k):
    """Pure-JAX mirror of the PyTorch forward (period=False)."""
    node_emb, t, n_t, _p = node_embeddings_tuple
    bs, N, C = x.shape
    D, K, _, O = weights_pool.shape

    a = jnp.matmul(node_emb, node_emb.T)
    a = jnp.broadcast_to(a[None], (bs, N, N))
    a_t = jnp.matmul(n_t[:, None, :], t[:, :, None])            # (bs, 1, 1)
    _a = a + a_t
    A = jax.nn.softmax(jax.nn.relu(_a), axis=2)

    eye = jnp.broadcast_to(jnp.eye(N, dtype=x.dtype)[None], (bs, N, N))
    supports = [eye, A]
    for _ in range(2, cheb_k):
        supports.append(2.0 * jnp.matmul(A, supports[-1]) - supports[-2])

    nemb = jnp.broadcast_to(node_emb[None], (bs, N, node_emb.shape[-1]))
    nemb = jnp.concatenate(
        [nemb, jnp.broadcast_to(n_t[:, None, :], (bs, N, n_t.shape[-1]))], axis=-1)

    cheb = jnp.stack(supports, axis=1)                            # (bs, K, N, N)
    weights = jnp.einsum('bnd,dkio->bnkio', nemb, weights_pool)
    bias = jnp.matmul(nemb, bias_pool)                            # (bs, N, O)
    x_g = jnp.einsum('bknm,bmc->bknc', cheb, x)
    x_g = jnp.transpose(x_g, (0, 2, 1, 3))                        # (bs, N, K, C)
    return jnp.einsum('bnki,bnkio->bno', x_g, weights) + bias


if __name__ == "__main__":
    # Small deterministic example: batch=2, nodes=16, in_dim=4, out_dim=32,
    # cheb_k=3, node-embed dim=8, time-feature dim=2  (=> embed_dim D = 10).
    bs, N, C, O = 2, 16, 4, 32
    cheb_k, E, T = 3, 8, 2
    D = E + T

    key = jax.random.PRNGKey(0)
    ks = jax.random.split(key, 7)
    x = jax.random.normal(ks[0], (bs, N, C), dtype=jnp.float32)
    node_emb = jax.random.normal(ks[1], (N, E), dtype=jnp.float32) * 0.5
    t = jax.random.normal(ks[2], (bs, T), dtype=jnp.float32) * 0.5
    n_t = jax.random.normal(ks[3], (bs, T), dtype=jnp.float32) * 0.5
    p = jnp.zeros((bs, 1, 1), dtype=jnp.float32)   # unused (period=False)
    weights_pool = jax.random.normal(ks[4], (D, cheb_k, C, O), dtype=jnp.float32) * 0.1
    bias_pool = jax.random.normal(ks[5], (D, O), dtype=jnp.float32) * 0.1

    ne_tuple = (node_emb, t, n_t, p)

    out = tgcn_forward(x, ne_tuple, weights_pool, bias_pool, cheb_k=cheb_k)
    out = jax.block_until_ready(out)

    ref = tgcn_reference(x, ne_tuple, weights_pool, bias_pool, cheb_k=cheb_k)
    ref = jax.block_until_ready(ref)

    assert out.shape == (bs, N, O), out.shape
    assert out.dtype == jnp.float32
    np.testing.assert_allclose(np.asarray(out), np.asarray(ref), rtol=1e-3, atol=1e-3)

    print("KERNEL_OK")
</pallas_src>

<mosaic_0001>
module attributes {stable_mosaic.version = 11 : i64} {
  func.func @tgcn_kernel(%arg0: i32, %arg1: memref<16x8xf32, #tpu.memory_space<vmem>>, %arg2: memref<1x1x2xf32, #tpu.memory_space<vmem>>, %arg3: memref<1x1x2xf32, #tpu.memory_space<vmem>>, %arg4: memref<1x16x4xf32, #tpu.memory_space<vmem>>, %arg5: memref<120x32xf32, #tpu.memory_space<vmem>>, %arg6: memref<10x32xf32, #tpu.memory_space<vmem>>, %arg7: memref<1x16x32xf32, #tpu.memory_space<vmem>>) attributes {dimension_semantics = [#tpu.dimension_semantics<parallel>], iteration_bounds = array<i64: 2>, scalar_prefetch = 0 : i64, scratch_operands = 0 : i64, tpu.core_type = #tpu.core_type<tc>, window_params = [{pipeline_mode = #tpu.pipeline_mode<synchronous>, transform_indices = @transform_0, window_bounds = array<i64: 16, 8>}, {transform_indices = @transform_1, window_bounds = array<i64: 1, 1, 2>}, {transform_indices = @transform_2, window_bounds = array<i64: 1, 1, 2>}, {transform_indices = @transform_3, window_bounds = array<i64: 1, 16, 4>}, {pipeline_mode = #tpu.pipeline_mode<synchronous>, transform_indices = @transform_4, window_bounds = array<i64: 120, 32>}, {pipeline_mode = #tpu.pipeline_mode<synchronous>, transform_indices = @transform_5, window_bounds = array<i64: 10, 32>}, {transform_indices = @transform_6, window_bounds = array<i64: 1, 16, 32>}]} {
    %c0 = arith.constant 0 : index
    %c0_0 = arith.constant 0 : index
    %0 = vector.load %arg1[%c0, %c0_0] : memref<16x8xf32, #tpu.memory_space<vmem>>, vector<16x8xf32>
    %c0_1 = arith.constant 0 : index
    %c0_2 = arith.constant 0 : index
    %c0_3 = arith.constant 0 : index
    %1 = vector.load %arg4[%c0_1, %c0_2, %c0_3] : memref<1x16x4xf32, #tpu.memory_space<vmem>>, vector<1x16x4xf32>
    %2 = vector.shape_cast %1 : vector<1x16x4xf32> to vector<16x4xf32>
    %c0_4 = arith.constant 0 : index
    %c0_5 = arith.constant 0 : index
    %c0_6 = arith.constant 0 : index
    %3 = vector.load %arg2[%c0_4, %c0_5, %c0_6] : memref<1x1x2xf32, #tpu.memory_space<vmem>>, vector<1x1x2xf32>
    %4 = vector.shape_cast %3 : vector<1x1x2xf32> to vector<1x2xf32>
    %c0_7 = arith.constant 0 : index
    %c0_8 = arith.constant 0 : index
    %c0_9 = arith.constant 0 : index
    %5 = vector.load %arg3[%c0_7, %c0_8, %c0_9] : memref<1x1x2xf32, #tpu.memory_space<vmem>>, vector<1x1x2xf32>
    %6 = vector.shape_cast %5 : vector<1x1x2xf32> to vector<1x2xf32>
    %cst = arith.constant dense<0.000000e+00> : vector<16x16xf32>
    %7 = tpu.matmul %0, %0, %cst {dimension_numbers = #tpu.dot_dimension_numbers<[1], [1], [0], [0], [0, 0, 1, 0], [], []>, precision = #tpu.contract_precision<fp32>} : vector<16x8xf32>, vector<16x8xf32>, vector<16x16xf32> -> vector<16x16xf32>
    %8 = arith.mulf %6, %4 : vector<1x2xf32>
    %cst_10 = arith.constant dense<0.000000e+00> : vector<1xf32>
    %9 = vector.multi_reduction <add>, %8, %cst_10 [1] : vector<1x2xf32> to vector<1xf32>
    %10 = vector.shape_cast %9 : vector<1xf32> to vector<1x1xf32>
    %11 = vector.broadcast %10 : vector<1x1xf32> to vector<16x16xf32>
    %12 = arith.addf %7, %11 : vector<16x16xf32>
    %cst_11 = arith.constant 0.000000e+00 : f32
    %13 = vector.broadcast %cst_11 : f32 to vector<16x16xf32>
    %14 = arith.maximumf %12, %13 : vector<16x16xf32>
    %cst_12 = arith.constant dense<0xFF800000> : vector<16xf32>
    %15 = vector.multi_reduction <maximumf>, %14, %cst_12 [1] : vector<16x16xf32> to vector<16xf32>
    %16 = vector.shape_cast %15 : vector<16xf32> to vector<16x1xf32>
    %17 = vector.broadcast %16 : vector<16x1xf32> to vector<16x16xf32>
    %18 = arith.subf %14, %17 : vector<16x16xf32>
    %19 = math.exp %18 : vector<16x16xf32>
    %cst_13 = arith.constant dense<0.000000e+00> : vector<16xf32>
    %20 = vector.multi_reduction <add>, %19, %cst_13 [1] : vector<16x16xf32> to vector<16xf32>
    %21 = vector.shape_cast %20 : vector<16xf32> to vector<16x1xf32>
    %22 = vector.broadcast %21 : vector<16x1xf32> to vector<16x16xf32>
    %23 = arith.divf %19, %22 : vector<16x16xf32>
    %24 = tpu.iota {dimensions = array<i32: 0>} : vector<16x16xi32>
    %25 = tpu.iota {dimensions = array<i32: 1>} : vector<16x16xi32>
    %26 = arith.cmpi eq, %24, %25 : vector<16x16xi32>
    %27 = arith.extui %26 : vector<16x16xi1> to vector<16x16xi32>
    %28 = arith.sitofp %27 : vector<16x16xi32> to vector<16x16xf32>
    %cst_14 = arith.constant dense<0.000000e+00> : vector<16x16xf32>
    %29 = tpu.matmul %23, %23, %cst_14 {dimension_numbers = #tpu.dot_dimension_numbers<[1], [0], [0], [1], [0, 0, 1, 1], [], []>, precision = #tpu.contract_precision<fp32>} : vector<16x16xf32>, vector<16x16xf32>, vector<16x16xf32> -> vector<16x16xf32>
    %cst_15 = arith.constant 2.000000e+00 : f32
    %30 = vector.broadcast %cst_15 : f32 to vector<16x16xf32>
    %31 = arith.mulf %30, %29 : vector<16x16xf32>
    %32 = arith.subf %31, %28 : vector<16x16xf32>
    %cst_16 = arith.constant dense<0.000000e+00> : vector<16x4xf32>
    %33 = tpu.matmul %28, %2, %cst_16 {dimension_numbers = #tpu.dot_dimension_numbers<[1], [0], [0], [1], [0, 0, 1, 1], [], []>, precision = #tpu.contract_precision<fp32>} : vector<16x16xf32>, vector<16x4xf32>, vector<16x4xf32> -> vector<16x4xf32>
    %cst_17 = arith.constant dense<0.000000e+00> : vector<16x4xf32>
    %34 = tpu.matmul %23, %2, %cst_17 {dimension_numbers = #tpu.dot_dimension_numbers<[1], [0], [0], [1], [0, 0, 1, 1], [], []>, precision = #tpu.contract_precision<fp32>} : vector<16x16xf32>, vector<16x4xf32>, vector<16x4xf32> -> vector<16x4xf32>
    %cst_18 = arith.constant dense<0.000000e+00> : vector<16x4xf32>
    %35 = tpu.matmul %32, %2, %cst_18 {dimension_numbers = #tpu.dot_dimension_numbers<[1], [0], [0], [1], [0, 0, 1, 1], [], []>, precision = #tpu.contract_precision<fp32>} : vector<16x16xf32>, vector<16x4xf32>, vector<16x4xf32> -> vector<16x4xf32>
    %36 = tpu.concatenate %33, %34, %35 in 1 : vector<16x4xf32>, vector<16x4xf32>, vector<16x4xf32> -> vector<16x12xf32>
    %37 = vector.shape_cast %6 : vector<1x2xf32> to vector<1x2xf32>
    %38 = vector.broadcast %37 : vector<1x2xf32> to vector<16x2xf32>
    %39 = tpu.concatenate %0, %38 in 1 : vector<16x8xf32>, vector<16x2xf32> -> vector<16x10xf32>
    %40 = vector.extract_strided_slice %39 {offsets = [0, 0], sizes = [16, 1], strides = [1, 1]} : vector<16x10xf32> to vector<16x1xf32>
    %41 = vector.broadcast %40 : vector<16x1xf32> to vector<16x12xf32>
    %42 = arith.mulf %41, %36 : vector<16x12xf32>
    %43 = vector.extract_strided_slice %39 {offsets = [0, 1], sizes = [16, 1], strides = [1, 1]} : vector<16x10xf32> to vector<16x1xf32>
    %44 = vector.broadcast %43 : vector<16x1xf32> to vector<16x12xf32>
    %45 = arith.mulf %44, %36 : vector<16x12xf32>
    %46 = vector.extract_strided_slice %39 {offsets = [0, 2], sizes = [16, 1], strides = [1, 1]} : vector<16x10xf32> to vector<16x1xf32>
    %47 = vector.broadcast %46 : vector<16x1xf32> to vector<16x12xf32>
    %48 = arith.mulf %47, %36 : vector<16x12xf32>
    %49 = vector.extract_strided_slice %39 {offsets = [0, 3], sizes = [16, 1], strides = [1, 1]} : vector<16x10xf32> to vector<16x1xf32>
    %50 = vector.broadcast %49 : vector<16x1xf32> to vector<16x12xf32>
    %51 = arith.mulf %50, %36 : vector<16x12xf32>
    %52 = vector.extract_strided_slice %39 {offsets = [0, 4], sizes = [16, 1], strides = [1, 1]} : vector<16x10xf32> to vector<16x1xf32>
    %53 = vector.broadcast %52 : vector<16x1xf32> to vector<16x12xf32>
    %54 = arith.mulf %53, %36 : vector<16x12xf32>
    %55 = vector.extract_strided_slice %39 {offsets = [0, 5], sizes = [16, 1], strides = [1, 1]} : vector<16x10xf32> to vector<16x1xf32>
    %56 = vector.broadcast %55 : vector<16x1xf32> to vector<16x12xf32>
    %57 = arith.mulf %56, %36 : vector<16x12xf32>
    %58 = vector.extract_strided_slice %39 {offsets = [0, 6], sizes = [16, 1], strides = [1, 1]} : vector<16x10xf32> to vector<16x1xf32>
    %59 = vector.broadcast %58 : vector<16x1xf32> to vector<16x12xf32>
    %60 = arith.mulf %59, %36 : vector<16x12xf32>
    %61 = vector.extract_strided_slice %39 {offsets = [0, 7], sizes = [16, 1], strides = [1, 1]} : vector<16x10xf32> to vector<16x1xf32>
    %62 = vector.broadcast %61 : vector<16x1xf32> to vector<16x12xf32>
    %63 = arith.mulf %62, %36 : vector<16x12xf32>
    %64 = vector.extract_strided_slice %39 {offsets = [0, 8], sizes = [16, 1], strides = [1, 1]} : vector<16x10xf32> to vector<16x1xf32>
    %65 = vector.broadcast %64 : vector<16x1xf32> to vector<16x12xf32>
    %66 = arith.mulf %65, %36 : vector<16x12xf32>
    %67 = vector.extract_strided_slice %39 {offsets = [0, 9], sizes = [16, 1], strides = [1, 1]} : vector<16x10xf32> to vector<16x1xf32>
    %68 = vector.broadcast %67 : vector<16x1xf32> to vector<16x12xf32>
    %69 = arith.mulf %68, %36 : vector<16x12xf32>
    %70 = tpu.concatenate %42, %45, %48, %51, %54, %57, %60, %63, %66, %69 in 1 : vector<16x12xf32>, vector<16x12xf32>, vector<16x12xf32>, vector<16x12xf32>, vector<16x12xf32>, vector<16x12xf32>, vector<16x12xf32>, vector<16x12xf32>, vector<16x12xf32>, vector<16x12xf32> -> vector<16x120xf32>
    %c0_19 = arith.constant 0 : index
    %c0_20 = arith.constant 0 : index
    %71 = vector.load %arg5[%c0_19, %c0_20] : memref<120x32xf32, #tpu.memory_space<vmem>>, vector<120x32xf32>
    %cst_21 = arith.constant dense<0.000000e+00> : vector<16x32xf32>
    %72 = tpu.matmul %70, %71, %cst_21 {dimension_numbers = #tpu.dot_dimension_numbers<[1], [0], [0], [1], [0, 0, 1, 1], [], []>, precision = #tpu.contract_precision<fp32>} : vector<16x120xf32>, vector<120x32xf32>, vector<16x32xf32> -> vector<16x32xf32>
    %c0_22 = arith.constant 0 : index
    %c0_23 = arith.constant 0 : index
    %73 = vector.load %arg6[%c0_22, %c0_23] : memref<10x32xf32, #tpu.memory_space<vmem>>, vector<10x32xf32>
    %cst_24 = arith.constant dense<0.000000e+00> : vector<16x32xf32>
    %74 = tpu.matmul %39, %73, %cst_24 {dimension_numbers = #tpu.dot_dimension_numbers<[1], [0], [0], [1], [0, 0, 1, 1], [], []>, precision = #tpu.contract_precision<fp32>} : vector<16x10xf32>, vector<10x32xf32>, vector<16x32xf32> -> vector<16x32xf32>
    %75 = arith.addf %72, %74 : vector<16x32xf32>
    %c0_25 = arith.constant 0 : index
    %c0_26 = arith.constant 0 : index
    %c0_27 = arith.constant 0 : index
    %76 = vector.load %arg7[%c0_25, %c0_26, %c0_27] : memref<1x16x32xf32, #tpu.memory_space<vmem>>, vector<1x16x32xf32>
    %77 = vector.shape_cast %76 : vector<1x16x32xf32> to vector<16x32xf32>
    %78 = vector.shape_cast %75 : vector<16x32xf32> to vector<1x16x32xf32>
    tpu.vector_store %arg7[%c0_25, %c0_26, %c0_27], %78 {strides = array<i32>} : memref<1x16x32xf32, #tpu.memory_space<vmem>>, vector<1x16x32xf32>,
    return
  }
  func.func @transform_0(%arg0: i32) -> (i32, i32) {
    %c0_i32 = arith.constant 0 : i32
    %c0_i32_0 = arith.constant 0 : i32
    %c0_i32_1 = arith.constant 0 : i32
    return %c0_i32, %c0_i32_0 : i32, i32
  }
  func.func @transform_1(%arg0: i32) -> (i32, i32, i32) {
    %c0_i32 = arith.constant 0 : i32
    %c0_i32_0 = arith.constant 0 : i32
    %c0_i32_1 = arith.constant 0 : i32
    return %arg0, %c0_i32, %c0_i32_0 : i32, i32, i32
  }
  func.func @transform_2(%arg0: i32) -> (i32, i32, i32) {
    %c0_i32 = arith.constant 0 : i32
    %c0_i32_0 = arith.constant 0 : i32
    %c0_i32_1 = arith.constant 0 : i32
    return %arg0, %c0_i32, %c0_i32_0 : i32, i32, i32
  }
  func.func @transform_3(%arg0: i32) -> (i32, i32, i32) {
    %c0_i32 = arith.constant 0 : i32
    %c0_i32_0 = arith.constant 0 : i32
    %c0_i32_1 = arith.constant 0 : i32
    return %arg0, %c0_i32, %c0_i32_0 : i32, i32, i32
  }
  func.func @transform_4(%arg0: i32) -> (i32, i32) {
    %c0_i32 = arith.constant 0 : i32
    %c0_i32_0 = arith.constant 0 : i32
    %c0_i32_1 = arith.constant 0 : i32
    return %c0_i32, %c0_i32_0 : i32, i32
  }
  func.func @transform_5(%arg0: i32) -> (i32, i32) {
    %c0_i32 = arith.constant 0 : i32
    %c0_i32_0 = arith.constant 0 : i32
    %c0_i32_1 = arith.constant 0 : i32
    return %c0_i32, %c0_i32_0 : i32, i32
  }
  func.func @transform_6(%arg0: i32) -> (i32, i32, i32) {
    %c0_i32 = arith.constant 0 : i32
    %c0_i32_0 = arith.constant 0 : i32
    %c0_i32_1 = arith.constant 0 : i32
    return %arg0, %c0_i32, %c0_i32_0 : i32, i32, i32
  }
}

</mosaic_0001>

<bundles_post_ra>
// kernel: tpu_custom_call.1
= control target key start
LH: loop header
LB: loop body
LE: loop exit
PB: predicated region body
PF: predicated region fallthrough
CT: control target
= control target key end

     0   :  { %11 = vsyncpa [#allocation3], 0  ;;  %s6459_s0 = inlined_call_operand.vmem [shape: f32[16,8], index: 0, kind: input, shape index: {}]   ;;  %s6460_s1 = inlined_call_operand.vmem [shape: f32[2,1,2], index: 1, kind: input, shape index: {}]   ;;  %s6461_s2 = inlined_call_operand.vmem [shape: f32[2,1,2], index: 2, kind: input, shape index: {}]   ;;  %s6462_s3 = inlined_call_operand.vmem [shape: f32[2,16,4], index: 3, kind: input, shape index: {}]   ;;  %s6463_s4 = inlined_call_operand.vmem [shape: f32[120,32], index: 4, kind: input, shape index: {}]   ;;  %s6464_s5 = inlined_call_operand.vmem [shape: f32[10,32], index: 5, kind: input, shape index: {}]   ;;  %s6465_s6 = inlined_call_operand.hbm [shape: f32[2,16,32], index: 6, kind: output, shape index: {}]  }
   0x1   :  { %13 = vsyncpa [#allocation3 + $0x1], 0  ;;  %s5713_s21 = smov 0   ;;  %s5715_s22 = smov 0  }
   0x2   :  { %s5717_s23 = smov 0   ;;  %s5719_s24 = smov 0  }
   0x3 LB: > { %s5734_s25 = sadd.s32 4294967295, %s5652_s24   ;;  %s4403_s26 = sadd.s32 4294967294, %s5652_s24   ;;  %s5652_s24 = sphi %s5719_s24, %s6471_s24   ;;  %s5648_s23 = sphi %s5717_s23, %s6470_s23   ;;  %s5644_s22 = sphi %s5715_s22, %s6469_s22   ;;  %s5640_s21 = sphi %s5713_s21, %s6468_s21  }
   0x4   : > { %s5738_s27 = sadd.s32 1, %s5652_s24   ;;  %s167_s28 = sadd.s32 1, %s5648_s23 }
   0x5   : > { %s164_s29 = ssub.s32 %s5652_s24, %s5738_s27  ;;  %p177_p0 = scmp.ne.s32.totalorder %s5648_s23, %s5644_s22 }
   0x6   : > { %p165_p1 = scmp.eq.s32.totalorder %s164_s29, 0  ;;  %p178_p2 = scmp.eq.s32.totalorder %s5734_s25, 1 }
   0x7   : > { %p183_p3 = scmp.ne.s32.totalorder %s5644_s22, %s5640_s21  ;;  %p184_p4 = scmp.eq.s32.totalorder %s4403_s26, 1 }
   0x8   : > { %s5749_s30 = scalar_select %p165_p1, %s5648_s23, %s167_s28  }
   0x9   : > { %p5751_p5 = por %p178_p2, %p177_p0  ;;  %p5755_p6 = por %p184_p4, %p183_p3 }
   0xa   : > { %p4406_p7 = scmp.ge.s32.totalorder %s5652_s24, 1  ;;  %p231_p8 = scmp.lt.s32.totalorder %s5652_s24, 3 }
   0xc   : > { %p232_p9 = pnand %p4406_p7, %p231_p8 }
   0xd   : > { %v5764_v0 = vld [vmem:[%s6459_s0] sm:$0xff] (!%p232_p9)  ;;  %v5769_v1 = vld [vmem:[%s6459_s0 + $0x8] sm:$0xff] (!%p232_p9)  ;;  %vm293_vm0 = vcmask (!%p232_p9), 64512   ;;  %p267_p10 = scmp.lt.s32.totalorder (!%p232_p9), %s5734_s25, 1  ;;  %v289_v2 = vlaneseq (!%p232_p9)  ;;  %vm285_vm1 = vcmask (!%p232_p9), 8192   ;;  %vm804_vm4 = vcmask (!%p232_p9), 130048  }
   0xe   : > { %235 = sbr.rel (%p232_p9) target bundleno = 1702 (0x6a6), region = 44  ;;  %v295_v3 = vsel (!%p232_p9), %vm293_vm0, %v5764_v0, 0  ;;  %v298_v4 = vsel (!%p232_p9), %vm293_vm0, %v5769_v1, 0  ;;  %s5655_s9 = smov (!%p232_p9), 8   ;;  %vm3122_vm5 = vcmask (!%p232_p9), 1041408   ;;  %vm3117_vm6 = vcmask (!%p232_p9), 80896  }
   0xf   : > { %v301_v5 = vand.u32 (!%p232_p9), 4294901760, %v295_v3  ;;  %v304_v6 = vand.u32 (!%p232_p9), 4294901760, %v298_v4  ;;  %v5777_v7 = vand.u32 (!%p232_p9), 127, %v289_v2  ;;  %v5779_v8 = vshrl.u32 (!%p232_p9), %v289_v2, 7  ;;  %s5664_s14 = smov (!%p232_p9), 4   ;;  %s5668_s10 = smov (!%p232_p9), 24  }
  0x10   : > { %vm2884_vm7 = vcmask (!%p232_p9), 31744   ;;  %s5669_s15 = smov (!%p232_p9), 36   ;;  %s5671_s11 = smov (!%p232_p9), 60   ;;  %vm3073_vm8 = vcmask (!%p232_p9), 97280   ;;  %vm3076_vm9 = vcmask (!%p232_p9), 195584   ;;  %vm3079_vm10 = vcmask (!%p232_p9), 293888  }
  0x11   : > { %v368_v9 = vsub.f32 (!%p232_p9), %v295_v3, %v301_v5  ;;  %v378_v10 = vsub.f32 (!%p232_p9), %v298_v4, %v304_v6  ;;  %4682 = vmatprep.mubr.f32.mxu0 (!%p232_p9), %v301_v5  ;;  %v5121_v11 = vpack.c.bf16 (!%p232_p9), %v304_v6, %v301_v5  ;;  %v5790_v14 = vadd.s32 (!%p232_p9), 8, %v5779_v8  ;;  %s5673_s26 = smov (!%p232_p9), 84   ;;  %s264_s12 = sand.u32 (!%p232_p9), 1, %s5644_s22  }
  0x12   : > { %vm832_vm2 = vcmp.eq.s32.totalorder (!%p232_p9), %v5779_v8, %v5777_v7  ;;  %v291_v33 = vsub.s32 (!%p232_p9), 0, %v5779_v8  ;;  %vm3082_vm11 = vcmask (!%p232_p9), 392192   ;;  %vm3085_vm12 = vcmask (!%p232_p9), 490496  }
  0x13   : > { %v369_v15 = vand.u32 (!%p232_p9), 4294901760, %v368_v9  ;;  %v379_v16 = vand.u32 (!%p232_p9), 4294901760, %v378_v10  ;;  %5122 = vmatprep.subr.bf16.mxu1 (!%p232_p9), %v5121_v11  ;;  %vm833_vm3 = vcmp.eq.s32.totalorder (!%p232_p9), %v5790_v14, %v5777_v7  ;;  %v5129_v29 = vpack.c.bf16 (!%p232_p9), %v378_v10, %v368_v9 }
  0x14   : > { %5124 = vmatpush3.bf16.xpose.msra.mxu1 (!%p232_p9), %v5121_v11  ;;  %vm3088_vm13 = vcmask (!%p232_p9), 588800   ;;  %vm3091_vm14 = vcmask (!%p232_p9), 687104   ;;  %vm3094_vm15 = vcmask (!%p232_p9), 785408  }
  0x15   : > { %s268_s13 = scalar_select %p267_p10, %s5734_s25, 1  ;;  %v370_v20 = vsub.f32 %v368_v9, %v369_v15  ;;  %v380_v21 = vsub.f32 %v378_v10, %v379_v16  ;;  %v5137_v30 = vpack.c.bf16 %v379_v16, %v369_v15 }
  0x17   : > { %s269_s16 = scalar_lea.vmem %s6460_s1, %s268_s13  ;;  %s272_s19 = scalar_lea.vmem %s6461_s2, %s268_s13  ;;  %v371_v25 = vand.u32 4294901760, %v370_v20  ;;  %v381_v26 = vand.u32 4294901760, %v380_v21 }
  0x18   : > { %s4423_s20 = sshll.u32 %s268_s13, 4  ;;  %v282_v12 = vld [vmem:[%s269_s16] sm:$0x1]  ;;  %s5672_s16 = smov 72  }
  0x19   : > { %v5787_v13 = vld [vmem:[%s272_s19] sm:$0x1]  ;;  %s277_s29 = scalar_lea.vmem %s6462_s3, %s4423_s20  ;;  %v5125_v28 = vpack.c.bf16 %v381_v26, %v371_v25  ;;  %4675 = vmatprep.mubr.f32.mxu1 %v371_v25  ;;  %s5667_s19 = smov 12  }
  0x1a   : > { %v284_v17 = vmul.f32 %v5787_v13, %v282_v12  ;;  %v5798_v18 = vld [vmem:[%s277_s29] sm:$0xff]  ;;  %v5800_v19 = vld [vmem:[%s277_s29 + $0x8] sm:$0xff]  ;;  %v2893_v4 = vrot.slane %v5787_v13, %v291_v33  ;;  %s5670_s20 = smov 48   ;;  %s4407_s13 = sshll.u32 %s264_s12, 4 }
  0x1b   : > { %v1357_v23 = vand.u32 4294901760, %v5798_v18  ;;  %v1360_v24 = vand.u32 4294901760, %v5800_v19  ;;  %5126 = vmatprep.subr.bf16.mxu0 %v5125_v28  ;;  %4676 = vmatmul.mubr.f32.vlgmr.msra.gmra.mrb[0].mxu1 %v381_v26 }
  0x1c   : > { %v286_v22 = vsel %vm285_vm1, %v284_v17, 0.0  ;;  %5128 = vmatpush3.bf16.xpose.msra.mxu0 %v5125_v28  ;;  %vm3628_vm1 = vcmask 982016  }
  0x1d   : > { %287 = vadd.xlane.f32.xlu0 %v286_v22  ;;  %v5807_v27 = vpack.c.bf16 %v1360_v24, %v1357_v23  ;;  %5130 = vmatprep.subr.bf16.mxu0 %v5129_v29  ;;  %v1445_v56 = vsub.f32 %v5798_v18, %v1357_v23  ;;  %v1452_v57 = vsub.f32 %v5800_v19, %v1360_v24 }
  0x1f   : > { %v1446_v58 = vand.u32 4294901760, %v1445_v56  ;;  %v1453_v59 = vand.u32 4294901760, %v1452_v57  ;;  %v5820_v3 = vpack.c.bf16 %v1452_v57, %v1445_v56 }
  0x21   : > { %v1447_v60 = vsub.f32 %v1445_v56, %v1446_v58  ;;  %v1454_v61 = vsub.f32 %v1452_v57, %v1453_v59  ;;  %v5659_v56 = vmov 4   ;;  %v5660_v57 = vmov 5  }
  0x23   : > { %4683 = vmatmul.mubr.f32.vlgmr.msra.gmra.mrb[0].mxu0 %v304_v6  ;;  %v1448_v62 = vand.u32 4294901760, %v1447_v60  ;;  %v1455_v63 = vand.u32 4294901760, %v1454_v61  ;;  %v5663_v60 = vmov 8   ;;  %v3115_v61 = vld [vmem:[%s6464_s5] sm:$0xff] }
  0x24   : > { %5132 = vmatpush3.bf16.xpose.msra.mxu0 %v5129_v29  ;;  %4689 = vmatprep.mubr.f32.mxu0 %v368_v9 }
  0x25   : > { %5134 = vmatprep.subr.bf16.mxu0 %v5121_v11  ;;  %v5816_v2 = vpack.c.bf16 %v1455_v63, %v1448_v62  ;;  %v3116_v62 = vld [vmem:[%s6464_s5 + $0x8] sm:$0x3] }
  0x26   : > { %v3124_v63 = vsel %vm3122_vm5, %v3116_v62, 0 }
  0x2b   : > { %4690 = vmatmul.mubr.f32.vlgmr.msra.gmra.mrb[0].mxu0 %v378_v10 }
  0x2c   : > { %5136 = vmatpush3.bf16.xpose.msra.mxu0 %v5121_v11  ;;  %4696 = vmatprep.mubr.f32.mxu0 %v369_v15 }
  0x2d   : > { %5138 = vmatprep.subr.bf16.mxu0 %v5137_v30 }
  0x33   : > { %4697 = vmatmul.mubr.f32.vlgmr.msra.gmra.mrb[0].mxu0 %v379_v16 }
  0x34   : > { %5140 = vmatpush3.bf16.xpose.msra.mxu0 %v5137_v30  ;;  %4703 = vmatprep.mubr.f32.mxu0 %v301_v5 }
  0x35   : > { %5142 = vmatprep.subr.bf16.mxu0 %v5121_v11 }
  0x3b   : > { %4704 = vmatmul.mubr.f32.vlgmr.msra.gmra.mrb[0].mxu0 %v304_v6 }
  0x3c   : > { %5144 = vmatpush3.bf16.xpose.msra.mxu0 %v5121_v11  ;;  %4710 = vmatprep.mubr.f32.mxu0 %v301_v5  ;;  %v5654_v5 = vmov 1  }
  0x3d   : > { %5198 = vmatprep.subr.bf16.mxu0 %v5816_v2  ;;  %5570 = vset.pattern.permute.xlu1 %v5654_v5 }
  0x3e   : > { %5569 = vset.pattern.permute.xlu0 %v5654_v5 }
  0x43   : > { %4711 = vmatmul.mubr.f32.vlgmr.msra.gmra.mrb[0].mxu0 %v304_v6 }
  0x44   : > { %5200 = vmatpush3.bf16.msra.mxu0 %v5816_v2 }
  0x45   : > { %5202 = vmatprep.subr.bf16.mxu0 %v5820_v3 }
  0xaa   : > { %v288_v34 = vpop.xlane.xlu0 %287 }
  0xab   : > { %v292_v35 = vrot.slane %v288_v34, %v291_v33 }
  0xee   : > { %v4677_v31 = vpop.f32.mrb[0].mxu1 }
  0xef   : > { %v373_v32 = vpop.f32.mrb[1].mxu1  ;;  %v384_v36 = vadd.f32 %v4677_v31, %v292_v35 }
  0xf0   : > { %v374_v37 = vadd.f32 %v373_v32, %v292_v35 }
 0x116   : > { %v4712_v38 = vpop.f32.mrb[0].mxu0 }
 0x117   : > { %v5434_v39 = vadd.f32 %v4712_v38, %v384_v36  ;;  %v792_v40 = vpop.f32.mrb[1].mxu0 }
 0x118   : > { %v5436_v41 = vadd.f32 %v792_v40, %v374_v37  ;;  %v5847_v40 = vpack.c.bf16 %v1453_v59, %v1446_v58  ;;  %v5661_v58 = vmov 6   ;;  %v5662_v59 = vmov 7  }
 0x119   : > { %v803_v42 = vmax.f32 %v5434_v39, 0.0 }
 0x11a   : > { %v802_v43 = vmax.f32 %v5436_v41, 0.0 }
 0x11b   : > { %v808_v44 = vsel %vm804_vm4, %v803_v42, -inf }
 0x11c   : > { %809 = vmax.xlane.f32.xlu1 %v808_v44  ;;  %v805_v45 = vsel %vm804_vm4, %v802_v43, -inf }
 0x11d   : > { %806 = vmax.xlane.f32.xlu0 %v805_v45 }
 0x1a9   : > { %v810_v46 = vpop.xlane.xlu1 %809 }
 0x1aa   : > { %v812_v47 = vsub.f32 %v803_v42, %v810_v46  ;;  %v807_v48 = vpop.xlane.xlu0 %806 }
 0x1ab   : > { %v811_v49 = vsub.f32 %v802_v43, %v807_v48  ;;  %v5656_v43 = vmov 0.0  }
 0x1ac   : > { %v815_v50 = vmul.f32 1.442695, %v812_v47  ;;  %v5862_v44 = vsel %vm832_vm2, 1.0, %v5656_v43  ;;  %v5869_v45 = vsel %vm833_vm3, 1.0, %v5656_v43  ;;  %vm4306_vm2 = vcmask 261120  }
 0x1ad   : > { %v813_v51 = vmul.f32 1.442695, %v811_v49  ;;  %v1351_v46 = vsel %vm804_vm4, %v5862_v44, 0  ;;  %v1354_v8 = vsel %vm804_vm4, %v5869_v45, 0 }
 0x1ae   : > { %5582 = vpow2.f32 %v815_v50  ;;  %v1424_v47 = vsub.f32 %v1351_v46, %v1351_v46  ;;  %v1434_v48 = vsub.f32 %v1354_v8, %v1354_v8 }
 0x1af   : > { %5584 = vpow2.f32 %v813_v51 }
 0x1b0   : > { %v1425_v49 = vand.u32 4294901760, %v1424_v47  ;;  %v1435_v7 = vand.u32 4294901760, %v1434_v48 }
 0x1b2   : > { %v1426_v14 = vsub.f32 %v1424_v47, %v1425_v49  ;;  %v1436_v50 = vsub.f32 %v1434_v48, %v1435_v7 }
 0x1b4   : > { %v1427_v51 = vand.u32 4294901760, %v1426_v14 }
 0x1b8   : > { %v5583_v52 = vpop.eup %5582 }
 0x1b9   : > { %v5585_v53 = vpop.eup %5584  ;;  %v820_v54 = vsel %vm804_vm4, %v5583_v52, 0.0 }
 0x1ba   : > { %821 = vadd.xlane.f32.xlu0 %v820_v54  ;;  %v817_v55 = vsel %vm804_vm4, %v5585_v53, 0.0 }
 0x1bb   : > { %818 = vadd.xlane.f32.xlu1 %v817_v55 }
 0x1cc   : > { %2894 = vrot.lane.b32.xlu1 %v2893_v4, %s5655_s9  ;;  %v3127_v4 = vand.u32 4294901760, %v3115_v61 }
 0x247   : > { %v822_v6 = vpop.xlane.xlu0 %821 }
 0x248   : > { %5586 = vrcp.f32 %v822_v6  ;;  %v819_v9 = vpop.xlane.xlu1 %818 }
 0x249   : > { %5588 = vrcp.f32 %v819_v9  ;;  %v3130_v9 = vand.u32 4294901760, %v3124_v63 }
 0x252   : > { %v5587_v10 = vpop.eup %5586 }
 0x253   : > { %v5589_v11 = vpop.eup %5588  ;;  %v826_v12 = vmul.f32 %v5587_v10, %v5583_v52  ;;  %v1437_v52 = vand.u32 4294901760, %v1436_v50 }
 0x254   : > { %v824_v15 = vmul.f32 %v5589_v11, %v5585_v53  ;;  %v2895_v53 = vpop.permute.xlu1 %2894 }
 0x255   : > { %v842_v16 = vsel %vm804_vm4, %v826_v12, 0  ;;  %v848_v17 = vand.u32 4294901760, %v826_v12  ;;  %v5906_v54 = vsel %vm293_vm0, %v5769_v1, %v2895_v53  ;;  %v5911_v55 = vsel %vm293_vm0, %v5764_v0, %v2895_v53 }
 0x256   : > { %v5826_v18 = vand.u32 4294901760, %v842_v16  ;;  %v839_v13 = vsel %vm804_vm4, %v824_v15, 0  ;;  %v845_v19 = vand.u32 4294901760, %v824_v15  ;;  %2916 = vperm.xlu1 %5570, %v5906_v54   ;;  %2912 = vperm.xlu0 %5569, %v5911_v55   ;;  %v5657_v0 = vmov 2  }
 0x257   : > { %v5829_v20 = vand.u32 4294901760, %v839_v13  ;;  %v940_v21 = vsub.f32 %v826_v12, %v848_v17  ;;  %v5658_v1 = vmov 3   ;;  %v3118_v5 = vsel %vm3117_vm6, %v5911_v55, 0 }
 0x258   : > { %v5831_v22 = vpack.c.bf16 %v848_v17, %v845_v19  ;;  %v922_v23 = vsub.f32 %v842_v16, %v5826_v18  ;;  %v933_v24 = vsub.f32 %v824_v15, %v845_v19  ;;  %v3120_v6 = vsel %vm3117_vm6, %v5906_v54, 0 }
 0x259   : > { %4808 = vmatprep.mubr.f32.mxu0 %v5829_v20  ;;  %v912_v25 = vsub.f32 %v839_v13, %v5829_v20  ;;  %v941_v26 = vand.u32 4294901760, %v940_v21  ;;  %v5945_v10 = vand.u32 4294901760, %v3118_v5  ;;  %v5947_v11 = vand.u32 4294901760, %v3120_v6 }
 0x25a   : > { %5146 = vmatprep.subr.bf16.mxu1 %v5831_v22  ;;  %4809 = vmatmul.mubr.f32.vlgmr.msra.gmra.mrb[2].mxu0 %v5826_v18  ;;  %v923_v28 = vand.u32 4294901760, %v922_v23  ;;  %v934_v29 = vand.u32 4294901760, %v933_v24  ;;  %v5153_v41 = vpack.c.bf16 %v940_v21, %v933_v24  ;;  %v5949_v12 = vpack.c.bf16 %v3130_v9, %v3127_v4 }
 0x25b   : > { %5148 = vmatpush3.bf16.msra.mxu1 %v5831_v22  ;;  %4815 = vmatprep.mubr.f32.mxu0 %v912_v25  ;;  %v913_v30 = vand.u32 4294901760, %v912_v25  ;;  %v942_v31 = vsub.f32 %v940_v21, %v941_v26  ;;  %v5952_v15 = vsub.f32 %v3118_v5, %v5945_v10  ;;  %v5955_v16 = vsub.f32 %v3120_v6, %v5947_v11 }
 0x25c   : > { %5204 = vmatpush3.bf16.msra.mxu0 %v5820_v3  ;;  %v924_v32 = vsub.f32 %v922_v23, %v923_v28  ;;  %v935_v33 = vsub.f32 %v933_v24, %v934_v29  ;;  %v5161_v42 = vpack.c.bf16 %v941_v26, %v934_v29  ;;  %5571 = vset.pattern.permute.xlu1 %v5657_v0 }
 0x25d   : > { %v914_v34 = vsub.f32 %v912_v25, %v913_v30  ;;  %v943_v35 = vand.u32 4294901760, %v942_v31  ;;  %5206 = vmatprep.subr.bf16.mxu0 %v5807_v27  ;;  %2922 = vperm.xlu1 %5571, %v5911_v55   ;;  %v3195_v17 = vand.u32 4294901760, %v5952_v15 }
 0x25e   : > { %v936_v36 = vand.u32 4294901760, %v935_v33  ;;  %v5843_v38 = vand.u32 4294901760, %v924_v32  ;;  %5575 = vset.pattern.permute.xlu0 %v5661_v58 }
 0x25f   : > { %v5841_v37 = vand.u32 4294901760, %v914_v34  ;;  %2962 = vperm.xlu0 %5575, %v5911_v55   ;;  %v3196_v13 = vsub.f32 %v5952_v15, %v3195_v17 }
 0x260   : > { %v5149_v39 = vpack.c.bf16 %v943_v35, %v936_v36 }
 0x261   : > { %4717 = vmatprep.mubr.f32.mxu1 %v5841_v37  ;;  %2926 = vperm.xlu1 %5571, %v5906_v54  }
 0x262   : > { %4718 = vmatmul.mubr.f32.vlgmr.msra.gmra.mrb[2].mxu1 %v5843_v38  ;;  %5150 = vmatprep.subr.bf16.mxu1 %v5149_v39 }
 0x263   : > { %4816 = vmatmul.mubr.f32.vlgmr.msra.gmra.mrb[2].mxu0 %v922_v23  ;;  %5152 = vmatpush3.bf16.msra.mxu1 %v5149_v39 }
 0x264   : > { %4724 = vmatprep.mubr.f32.mxu1 %v5829_v20  ;;  %4822 = vmatprep.mubr.f32.mxu0 %v913_v30 }
 0x265   : > { %5154 = vmatprep.subr.bf16.mxu1 %v5153_v41  ;;  %5208 = vmatpush3.bf16.msra.mxu0 %v5807_v27 }
 0x266   : > { %5210 = vmatprep.subr.bf16.mxu0 %v5847_v40  ;;  %5572 = vset.pattern.permute.xlu1 %v5658_v1 }
 0x267   : > { %2932 = vperm.xlu1 %5572, %v5911_v55   ;;  %2966 = vperm.xlu0 %5575, %v5906_v54  }
 0x26a   : > { %4725 = vmatmul.mubr.f32.vlgmr.msra.gmra.mrb[2].mxu1 %v5826_v18 }
 0x26b   : > { %5156 = vmatpush3.bf16.msra.mxu1 %v5153_v41  ;;  %4823 = vmatmul.mubr.f32.vlgmr.msra.gmra.mrb[2].mxu0 %v923_v28 }
 0x26c   : > { %4731 = vmatprep.mubr.f32.mxu1 %v912_v25  ;;  %5158 = vmatprep.subr.bf16.mxu1 %v5831_v22 }
 0x26d   : > { %4829 = vmatprep.mubr.f32.mxu0 %v5829_v20  ;;  %5212 = vmatpush3.bf16.msra.mxu0 %v5847_v40 }
 0x26e   : > { %5214 = vmatprep.subr.bf16.mxu0 %v5807_v27  ;;  %2936 = vperm.xlu1 %5572, %v5906_v54  }
 0x26f   : > { %5577 = vset.pattern.permute.xlu0 %v5663_v60 }
 0x270   : > { %2982 = vperm.xlu0 %5577, %v5911_v55  }
 0x272   : > { %4732 = vmatmul.mubr.f32.vlgmr.msra.gmra.mrb[2].mxu1 %v922_v23  ;;  %5573 = vset.pattern.permute.xlu1 %v5659_v56 }
 0x273   : > { %5160 = vmatpush3.bf16.msra.mxu1 %v5831_v22  ;;  %4830 = vmatmul.mubr.f32.vlgmr.msra.gmra.mrb[2].mxu0 %v5826_v18 }
 0x274   : > { %4738 = vmatprep.mubr.f32.mxu1 %v913_v30  ;;  %5162 = vmatprep.subr.bf16.mxu1 %v5161_v42 }
 0x275   : > { %4836 = vmatprep.mubr.f32.mxu0 %v5829_v20  ;;  %5216 = vmatpush3.bf16.msra.mxu0 %v5807_v27 }
 0x276   : > { %2942 = vperm.xlu1 %5573, %v5911_v55   ;;  %5242 = vmatprep.subr.bf16.mxu0 %v5949_v12 }
 0x27a   : > { %4739 = vmatmul.mubr.f32.vlgmr.msra.gmra.mrb[2].mxu1 %v923_v28  ;;  %2946 = vperm.xlu1 %5573, %v5906_v54  }
 0x27b   : > { %5164 = vmatpush3.bf16.msra.mxu1 %v5161_v42  ;;  %4837 = vmatmul.mubr.f32.vlgmr.msra.gmra.mrb[2].mxu0 %v5826_v18 }
 0x27c   : > { %4745 = vmatprep.mubr.f32.mxu1 %v5829_v20  ;;  %5166 = vmatprep.subr.bf16.mxu1 %v5831_v22 }
 0x27d   : > { %5244 = vmatpush3.bf16.msra.mxu0 %v5949_v12 }
 0x27e   : > { %5574 = vset.pattern.permute.xlu1 %v5660_v57  ;;  %v5666_v57 = vmov 0  }
 0x27f   : > { %2952 = vperm.xlu1 %5574, %v5911_v55  }
 0x282   : > { %4746 = vmatmul.mubr.f32.vlgmr.msra.gmra.mrb[2].mxu1 %v5826_v18 }
 0x283   : > { %5168 = vmatpush3.bf16.msra.mxu1 %v5831_v22  ;;  %4752 = vmatprep.mubr.f32.mxu1 %v5829_v20  ;;  %v3197_v20 = vand.u32 4294901760, %v3196_v13 }
 0x284   : > { %5170 = vmatprep.subr.bf16.mxu1 %v5807_v27  ;;  %2956 = vperm.xlu1 %5574, %v5906_v54  }
 0x285   : > { %4885 = vmatprep.mubr.f32.mxu0 %v3197_v20 }
 0x288   : > { %5576 = vset.pattern.permute.xlu1 %v5662_v59 }
 0x289   : > { %2972 = vperm.xlu1 %5576, %v5911_v55  }
 0x28a   : > { %4753 = vmatmul.mubr.f32.vlgmr.msra.gmra.mrb[2].mxu1 %v5826_v18  ;;  %v3205_v18 = vand.u32 4294901760, %v5955_v16 }
 0x28b   : > { %5172 = vmatpush3.bf16.msra.mxu1 %v5807_v27  ;;  %4759 = vmatprep.mubr.f32.mxu1 %v1427_v51 }
 0x28c   : > { %5174 = vmatprep.subr.bf16.mxu1 %v5816_v2  ;;  %v3206_v19 = vsub.f32 %v5955_v16, %v3205_v18 }
 0x28d   : > { %2976 = vperm.xlu1 %5576, %v5906_v54  }
 0x28e   : > { %4760 = vmatmul.mubr.f32.vlgmr.msra.gmra.mrb[4].mxu1 %v1437_v52  ;;  %v3207_v21 = vand.u32 4294901760, %v3206_v19 }
 0x28f   : > { %5176 = vmatpush3.bf16.msra.mxu1 %v5816_v2  ;;  %4766 = vmatprep.mubr.msk.f32.mxu1 %vm804_vm4, %v5862_v44 }
 0x290   : > { %5178 = vmatprep.subr.bf16.mxu1 %v5820_v3  ;;  %4886 = vmatmul.mubr.f32.vlgmr.msra.gmra.mrb[4].mxu0 %v3207_v21  ;;  %v6032_v21 = vld [vmem:[%s6463_s4] sm:$0xff] }
 0x291   : > { %5578 = vset.pattern.permute.xlu1 %v5663_v60  ;;  %4892 = vmatprep.mubr.f32.mxu0 %v5945_v10 }
 0x292   : > { %2986 = vperm.xlu1 %5578, %v5906_v54  }
 0x296   : > { %4767 = vmatmul.mubr.msk.f32.vlgmr.msra.gmra.mrb[4].mxu1 %vm804_vm4, %v5869_v45 }
 0x297   : > { %5180 = vmatpush3.bf16.msra.mxu1 %v5820_v3  ;;  %4773 = vmatprep.mubr.f32.mxu1 %v1424_v47 }
 0x298   : > { %5182 = vmatprep.subr.bf16.mxu1 %v5807_v27 }
 0x29e   : > { %4774 = vmatmul.mubr.f32.vlgmr.msra.gmra.mrb[4].mxu1 %v1434_v48 }
 0x29f   : > { %5184 = vmatpush3.bf16.msra.mxu1 %v5807_v27  ;;  %4780 = vmatprep.mubr.f32.mxu1 %v1425_v49 }
 0x2a0   : > { %5186 = vmatprep.subr.bf16.mxu1 %v5847_v40 }
 0x2a6   : > { %4781 = vmatmul.mubr.f32.vlgmr.msra.gmra.mrb[4].mxu1 %v1435_v7 }
 0x2a7   : > { %5188 = vmatpush3.bf16.msra.mxu1 %v5847_v40  ;;  %4787 = vmatprep.mubr.msk.f32.mxu1 %vm804_vm4, %v5862_v44 }
 0x2a8   : > { %5190 = vmatprep.subr.bf16.mxu1 %v5807_v27 }
 0x2ae   : > { %4788 = vmatmul.mubr.msk.f32.vlgmr.msra.gmra.mrb[4].mxu1 %vm804_vm4, %v5869_v45 }
 0x2af   : > { %5192 = vmatpush3.bf16.msra.mxu1 %v5807_v27  ;;  %4794 = vmatprep.mubr.msk.f32.mxu1 %vm804_vm4, %v5862_v44 }
 0x2b0   : > { %5194 = vmatprep.subr.bf16.mxu1 %v5807_v27 }
 0x2b6   : > { %4795 = vmatmul.mubr.msk.f32.vlgmr.msra.gmra.mrb[4].mxu1 %vm804_vm4, %v5869_v45 }
 0x2b7   : > { %5196 = vmatpush3.bf16.msra.mxu1 %v5807_v27  ;;  %4801 = vmatprep.mubr.f32.mxu1 %v5841_v37 }
 0x2b8   : > { %5218 = vmatprep.subr.bf16.mxu1 %v5807_v27 }
 0x2ba   : > { %4802 = vmatmul.mubr.f32.vlgmr.msra.gmra.mrb[6].mxu1 %v5843_v38 }
 0x2bb   : > { %5220 = vmatpush3.bf16.msra.mxu1 %v5807_v27 }
 0x2bc   : > { %5222 = vmatprep.subr.bf16.mxu1 %v5816_v2 }
 0x2d5   : > { %v2917_v60 = vpop.permute.xlu1 %2916 }
 0x34e   : > { %v4838_v22 = vpop.f32.mrb[2].mxu0 }
 0x34f   : > { %v2350_v23 = vpop.f32.mrb[3].mxu0 }
 0x35d   : > { %v4754_v24 = vpop.f32.mrb[2].mxu1 }
 0x35e   : > { %v1347_v25 = vmul.f32 2.0, %v4754_v24  ;;  %v1336_v26 = vpop.f32.mrb[3].mxu1 }
 0x35f   : > { %v1346_v28 = vmul.f32 2.0, %v1336_v26 }
 0x360   : > { %v1349_v29 = vsub.f32 %v1347_v25, %v5869_v45  ;;  %v3222_v45 = vsub.f32 %v3124_v63, %v3130_v9 }
 0x361   : > { %v1348_v30 = vsub.f32 %v1346_v28, %v5862_v44  ;;  %v3215_v44 = vsub.f32 %v3115_v61, %v3127_v4  ;;  %v2923_v61 = vpop.permute.xlu1 %2922 }
 0x362   : > { %v2364_v31 = vsel %vm804_vm4, %v1349_v29, 0  ;;  %v3223_v47 = vand.u32 4294901760, %v3222_v45  ;;  %v3636_v29 = vand.u32 4294901760, %v6032_v21 }
 0x363   : > { %v2443_v32 = vand.u32 4294901760, %v2364_v31  ;;  %v2361_v33 = vsel %vm804_vm4, %v1348_v30, 0  ;;  %v3216_v46 = vand.u32 4294901760, %v3215_v44  ;;  %v5249_v14 = vpack.c.bf16 %v3222_v45, %v3215_v44 }
 0x364   : > { %v2433_v34 = vand.u32 4294901760, %v2361_v33  ;;  %v3224_v48 = vsub.f32 %v3222_v45, %v3223_v47 }
 0x365   : > { %v2444_v35 = vsub.f32 %v2364_v31, %v2443_v32  ;;  %v3217_v8 = vsub.f32 %v3215_v44, %v3216_v46  ;;  %v2927_v62 = vpop.permute.xlu1 %2926 }
 0x366   : > { %v2434_v36 = vsub.f32 %v2361_v33, %v2433_v34  ;;  %v3225_v49 = vand.u32 4294901760, %v3224_v48  ;;  %v6058_v33 = vld [vmem:[%s6463_s4 + $0x18] sm:$0xff] }
 0x367   : > { %v2445_v37 = vand.u32 4294901760, %v2444_v35  ;;  %v6110_v48 = vld [vmem:[%s6463_s4 + $0x38] sm:$0xff] }
 0x368   : > { %v2435_v38 = vand.u32 4294901760, %v2434_v36 }
 0x369   : > { %v2446_v39 = vsub.f32 %v2444_v35, %v2445_v37  ;;  %v2933_v63 = vpop.permute.xlu1 %2932 }
 0x36a   : > { %v2436_v41 = vsub.f32 %v2434_v36, %v2435_v38 }
 0x36b   : > { %v2447_v43 = vand.u32 4294901760, %v2446_v39 }
 0x36c   : > { %v2437_v42 = vand.u32 4294901760, %v2436_v41  ;;  %v6080_v41 = vld [vmem:[%s6463_s4 + $0x20] sm:$0xff] }
 0x36d   : > { %v2937_v4 = vpop.permute.xlu1 %2936 }
 0x36e   : > { %4843 = vmatprep.mubr.f32.mxu1 %v2437_v42  ;;  %v6085_v42 = vld [vmem:[%s6463_s4 + $0x28] sm:$0xff] }
 0x36f   : > { %4844 = vmatmul.mubr.f32.vlgmr.msra.gmra.mrb[8].mxu1 %v2447_v43  ;;  %v3648_v43 = vand.u32 4294901760, %v6080_v41  ;;  %v3651_v44 = vand.u32 4294901760, %v6085_v42 }
 0x370   : > { %5224 = vmatpush3.bf16.msra.mxu1 %v5816_v2  ;;  %4850 = vmatprep.mubr.f32.mxu1 %v2433_v34  ;;  %v3218_v2 = vand.u32 4294901760, %v3217_v8  ;;  %v6105_v8 = vld [vmem:[%s6463_s4 + $0x30] sm:$0xff] }
 0x371   : > { %5226 = vmatprep.subr.bf16.mxu1 %v5820_v3  ;;  %v6010_v5 = vpop.permute.xlu1 %2942 }
 0x372   : > { %v5245_v7 = vpack.c.bf16 %v3225_v49, %v3218_v2  ;;  %v3654_v2 = vand.u32 4294901760, %v6105_v8  ;;  %v3657_v49 = vand.u32 4294901760, %v6110_v48 }
 0x374   : > { %5246 = vmatprep.subr.bf16.mxu0 %v5245_v7 }
 0x375   : > { %5248 = vmatpush3.bf16.msra.mxu0 %v5245_v7  ;;  %v2947_v6 = vpop.permute.xlu1 %2946 }
 0x376   : > { %5250 = vmatprep.subr.bf16.mxu0 %v5249_v14 }
 0x377   : > { %4851 = vmatmul.mubr.f32.vlgmr.msra.gmra.mrb[8].mxu1 %v2443_v32 }
 0x378   : > { %5228 = vmatpush3.bf16.msra.mxu1 %v5820_v3  ;;  %4857 = vmatprep.mubr.f32.mxu1 %v2434_v36 }
 0x379   : > { %5230 = vmatprep.subr.bf16.mxu1 %v5807_v27  ;;  %4893 = vmatmul.mubr.f32.vlgmr.msra.gmra.mrb[4].mxu0 %v5947_v11  ;;  %v6012_v9 = vpop.permute.xlu1 %2952 }
 0x37a   : > { %5252 = vmatpush3.bf16.msra.mxu0 %v5249_v14  ;;  %4899 = vmatprep.mubr.f32.mxu0 %v5952_v15 }
 0x37b   : > { %5254 = vmatprep.subr.bf16.mxu0 %v5949_v12 }
 0x37f   : > { %4858 = vmatmul.mubr.f32.vlgmr.msra.gmra.mrb[8].mxu1 %v2444_v35 }
 0x380   : > { %5232 = vmatpush3.bf16.msra.mxu1 %v5807_v27  ;;  %4864 = vmatprep.mubr.f32.mxu1 %v2435_v38 }
 0x381   : > { %5234 = vmatprep.subr.bf16.mxu1 %v5847_v40  ;;  %4900 = vmatmul.mubr.f32.vlgmr.msra.gmra.mrb[4].mxu0 %v5955_v16 }
 0x382   : > { %5256 = vmatpush3.bf16.msra.mxu0 %v5949_v12  ;;  %4906 = vmatprep.mubr.f32.mxu0 %v3195_v17 }
 0x387   : > { %4865 = vmatmul.mubr.f32.vlgmr.msra.gmra.mrb[8].mxu1 %v2445_v37  ;;  %v3645_v37 = vand.u32 4294901760, %v6058_v33 }
 0x388   : > { %5236 = vmatpush3.bf16.msra.mxu1 %v5847_v40  ;;  %4871 = vmatprep.mubr.f32.mxu1 %v2433_v34  ;;  %v5257_v40 = vpack.c.bf16 %v3223_v47, %v3216_v46  ;;  %v6099_v47 = vpack.c.bf16 %v3651_v44, %v3648_v43 }
 0x389   : > { %v5979_v3 = vpop.f32.mrb[4].mxu1  ;;  %5238 = vmatprep.subr.bf16.mxu1 %v5807_v27  ;;  %4907 = vmatmul.mubr.f32.vlgmr.msra.gmra.mrb[4].mxu0 %v3205_v18 }
 0x38a   : > { %v5983_v50 = vpop.f32.mrb[5].mxu1  ;;  %5258 = vmatprep.subr.bf16.mxu0 %v5257_v40  ;;  %4913 = vmatprep.mubr.f32.mxu0 %v5945_v10 }
 0x38b   : > { %5260 = vmatpush3.bf16.msra.mxu0 %v5257_v40 }
 0x38c   : > { %5262 = vmatprep.subr.bf16.mxu0 %v5949_v12 }
 0x38d   : > { %v4803_v51 = vpop.f32.mrb[6].mxu1 }
 0x38e   : > { %v5437_v52 = vadd.f32 %v4838_v22, %v4803_v51  ;;  %v1931_v53 = vpop.f32.mrb[7].mxu1  ;;  %v6037_v22 = vld [vmem:[%s6463_s4 + $0x8] sm:$0xff] }
 0x38f   : > { %v5438_v0 = vadd.f32 %v2350_v23, %v1931_v53  ;;  %4872 = vmatmul.mubr.f32.vlgmr.msra.gmra.mrb[8].mxu1 %v2443_v32  ;;  %v3639_v30 = vand.u32 4294901760, %v6037_v22  ;;  %v6135_v51 = vld [vmem:[%s6463_s4 + $0x48] sm:$0xff] }
 0x390   : > { %2872 = vrot.lane.b32.xlu1 %v5437_v52, %s5664_s14  ;;  %5240 = vmatpush3.bf16.msra.mxu1 %v5807_v27  ;;  %v5665_v27 = vmov 9   ;;  %v3663_v53 = vand.u32 4294901760, %v6135_v51 }
 0x391   : > { %4878 = vmatprep.mubr.f32.mxu1 %v2433_v34  ;;  %2870 = vrot.lane.b32.xlu0 %v5438_v0, %s5664_s14  ;;  %v6065_v35 = vpack.c.bf16 %v3639_v30, %v3636_v29  ;;  %s266_s14 = scalar_lea.vmem [#allocation2], %s4407_s13 }
 0x392   : > { %4914 = vmatmul.mubr.f32.vlgmr.msra.gmra.mrb[4].mxu0 %v5947_v11  ;;  %5580 = vset.pattern.permute.xlu0 %v5665_v27 }
 0x393   : > { %5264 = vmatpush3.bf16.msra.mxu0 %v5949_v12  ;;  %4920 = vmatprep.mubr.f32.mxu0 %v5945_v10  ;;  %v2913_v10 = vpop.permute.xlu0 %2912 }
 0x394   : > { %5579 = vset.pattern.permute.xlu1 %v5665_v27  ;;  %5350 = vmatprep.subr.bf16.mxu0 %v6065_v35 }
 0x395   : > { %5266 = vmatprep.subr.bf16.mxu1 %v6065_v35 }
 0x397   : > { %4879 = vmatmul.mubr.f32.vlgmr.msra.gmra.mrb[8].mxu1 %v2443_v32  ;;  %v6053_v32 = vld [vmem:[%s6463_s4 + $0x10] sm:$0xff] }
 0x398   : > { %v3642_v36 = vand.u32 4294901760, %v6053_v32  ;;  %5268 = vmatpush3.bf16.msra.mxu1 %v6065_v35 }
 0x39a   : > { %4921 = vmatmul.mubr.f32.vlgmr.msra.gmra.mrb[4].mxu0 %v5947_v11  ;;  %v6014_v11 = vpop.permute.xlu1 %2956  ;;  %v6075_v39 = vpack.c.bf16 %v3645_v37, %v3642_v36 }
 0x39b   : > { %5352 = vmatpush3.bf16.msra.mxu0 %v6065_v35 }
 0x39c   : > { %5354 = vmatprep.subr.bf16.mxu0 %v6075_v39  ;;  %5270 = vmatprep.subr.bf16.mxu1 %v6075_v39 }
 0x39d   : > { %5272 = vmatpush3.bf16.msra.mxu1 %v6075_v39 }
 0x39e   : > { %5274 = vmatprep.subr.bf16.mxu1 %v6099_v47 }
 0x39f   : > { %5356 = vmatpush3.bf16.msra.mxu0 %v6075_v39 }
 0x3a0   : > { %5358 = vmatprep.subr.bf16.mxu0 %v6099_v47 }
 0x3a1   : > { %5276 = vmatpush3.bf16.msra.mxu1 %v6099_v47 }
 0x3a3   : > { %5360 = vmatpush3.bf16.msra.mxu0 %v6099_v47 }
 0x46a   : > { %v4880_v1 = vpop.f32.mrb[8].mxu1 }
 0x46b   : > { %2880 = vrot.lane.b32.xlu0 %v4880_v1, %s5655_s9  ;;  %v2858_v56 = vpop.f32.mrb[9].mxu1  ;;  %v6156_v1 = vld [vmem:[%s6463_s4 + $0x50] sm:$0xff] }
 0x46c   : > { %2878 = vrot.lane.b32.xlu1 %v2858_v56, %s5655_s9  ;;  %v6161_v56 = vld [vmem:[%s6463_s4 + $0x58] sm:$0xff] }
 0x46d   : > { %v6006_v58 = vpop.f32.mrb[4].mxu0 }
 0x46e   : > { %v6008_v59 = vpop.f32.mrb[5].mxu0 }
 0x46f   : > { %2996 = vperm.xlu0 %5580, %v5906_v54  }
 0x470   : > { %2992 = vperm.xlu1 %5579, %v5911_v55  }
 0x474   : > { %5581 = vset.pattern.permute.xlu1 %v5666_v57  ;;  %v3666_v57 = vand.u32 4294901760, %v6156_v1 }
 0x475   : > { %2901 = vperm.xlu1 %5581, %v5911_v55   ;;  %v6016_v55 = vpop.permute.xlu0 %2962 }
 0x479   : > { %2906 = vperm.xlu1 %5581, %v5906_v54   ;;  %v6018_v54 = vpop.permute.xlu1 %2972  ;;  %v6020_v12 = vpop.permute.xlu0 %2966 }
 0x47d   : > { %v6022_v15 = vpop.permute.xlu1 %2976  ;;  %v6024_v16 = vpop.permute.xlu0 %2982 }
 0x481   : > { %v6026_v17 = vpop.permute.xlu1 %2986  ;;  %v2871_v18 = vpop.permute.xlu0 %2870 }
 0x482   : > { %v2885_v23 = vsel %vm2884_vm7, %v5983_v50, %v2871_v18  ;;  %v6130_v50 = vld [vmem:[%s6463_s4 + $0x40] sm:$0xff] }
 0x483   : > { %v3660_v52 = vand.u32 4294901760, %v6130_v50 }
 0x485   : > { %v2873_v13 = vpop.permute.xlu1 %2872  ;;  %v6150_v27 = vpack.c.bf16 %v3663_v53, %v3660_v52 }
 0x486   : > { %v2886_v19 = vsel %vm2884_vm7, %v5979_v3, %v2873_v13  ;;  %v6124_v3 = vpack.c.bf16 %v3657_v49, %v3654_v2 }
 0x488   : > { %5362 = vmatprep.subr.bf16.mxu0 %v6124_v3  ;;  %5278 = vmatprep.subr.bf16.mxu1 %v6124_v3 }
 0x489   : > { %5364 = vmatpush3.bf16.msra.mxu0 %v6124_v3  ;;  %5280 = vmatpush3.bf16.msra.mxu1 %v6124_v3 }
 0x48a   : > { %5366 = vmatprep.subr.bf16.mxu0 %v6150_v27  ;;  %5282 = vmatprep.subr.bf16.mxu1 %v6150_v27 }
 0x48d   : > { %5368 = vmatpush3.bf16.msra.mxu0 %v6150_v27  ;;  %5284 = vmatpush3.bf16.msra.mxu1 %v6150_v27 }
 0x4dd   : > { %v2881_v20 = vpop.permute.xlu0 %2880 }
 0x4de   : > { %v6041_v24 = vsel %vm293_vm0, %v2886_v19, %v2881_v20  ;;  %v2879_v25 = vpop.permute.xlu1 %2878 }
 0x4df   : > { %v6044_v26 = vsel %vm293_vm0, %v2885_v23, %v2879_v25  ;;  %v2920_v28 = vmul.f32 %v2917_v60, %v6041_v24  ;;  %v2930_v34 = vmul.f32 %v2927_v62, %v6041_v24  ;;  %v2940_v45 = vmul.f32 %v2937_v4, %v6041_v24  ;;  %v6182_v4 = vld [vmem:[%s6463_s4 + $0x60] sm:$0xff] }
 0x4e0   : > { %v2919_v31 = vmul.f32 %v2913_v10, %v6044_v26  ;;  %v2929_v38 = vmul.f32 %v2923_v61, %v6044_v26  ;;  %v2939_v46 = vmul.f32 %v2933_v63, %v6044_v26  ;;  %v2950_v7 = vmul.f32 %v2947_v6, %v6041_v24 }
 0x4e1   : > { %3005 = vrot.lane.b32.xlu1 %v2920_v28, %s5667_s19  ;;  %v2949_v14 = vmul.f32 %v6010_v5, %v6044_v26  ;;  %v2960_v0 = vmul.f32 %v6014_v11, %v6041_v24  ;;  %v2959_v40 = vmul.f32 %v6012_v9, %v6044_v26  ;;  %v3669_v60 = vand.u32 4294901760, %v6161_v56  ;;  %v6187_v5 = vld [vmem:[%s6463_s4 + $0x68] sm:$0xff] }
 0x4e2   : > { %3003 = vrot.lane.b32.xlu0 %v2919_v31, %s5667_s19  ;;  %v2970_v61 = vmul.f32 %v6020_v12, %v6041_v24  ;;  %v2969_v62 = vmul.f32 %v6016_v55, %v6044_v26  ;;  %v3672_v6 = vand.u32 4294901760, %v6182_v4  ;;  %v3675_v9 = vand.u32 4294901760, %v6187_v5  ;;  %v6208_v12 = vld [vmem:[%s6463_s4 + $0x70] sm:$0xff] }
 0x4e3   : > { %v6176_v63 = vpack.c.bf16 %v3669_v60, %v3666_v57  ;;  %v2980_v10 = vmul.f32 %v6022_v15, %v6041_v24  ;;  %v2979_v11 = vmul.f32 %v6018_v54, %v6044_v26  ;;  %v6214_v54 = vsub.f32 %v6032_v21, %v3636_v29 }
 0x4e4   : > { %v6202_v55 = vpack.c.bf16 %v3675_v9, %v3672_v6  ;;  %v6219_v15 = vsub.f32 %v6037_v22, %v3639_v30  ;;  %v2990_v18 = vmul.f32 %v6026_v17, %v6041_v24  ;;  %v6225_v13 = vand.u32 4294901760, %v6208_v12 }
 0x4e5   : > { %3013 = vrot.lane.b32.xlu1 %v2930_v34, %s5668_s10  ;;  %5370 = vmatprep.subr.bf16.mxu0 %v6176_v63  ;;  %v2989_v20 = vmul.f32 %v6024_v16, %v6044_v26  ;;  %v3738_v21 = vand.u32 4294901760, %v6214_v54  ;;  %v6243_v29 = vsub.f32 %v6053_v32, %v3642_v36  ;;  %v6248_v30 = vsub.f32 %v6058_v33, %v3645_v37 }
 0x4e6   : > { %3011 = vrot.lane.b32.xlu0 %v2929_v38, %s5668_s10  ;;  %5286 = vmatprep.subr.bf16.mxu1 %v6176_v63  ;;  %v3745_v23 = vand.u32 4294901760, %v6219_v15  ;;  %s5674_s10 = smov 96   ;;  %v3765_v33 = vsub.f32 %v6080_v41, %v3648_v43  ;;  %v3772_v37 = vsub.f32 %v6085_v42, %v3651_v44  ;;  %v3779_v44 = vsub.f32 %v6105_v8, %v3654_v2 }
 0x4e7   : > { %5372 = vmatpush3.bf16.msra.mxu0 %v6176_v63  ;;  %5288 = vmatpush3.bf16.msra.mxu1 %v6176_v63  ;;  %v3739_v17 = vsub.f32 %v6214_v54, %v3738_v21  ;;  %v3759_v32 = vand.u32 4294901760, %v6248_v30  ;;  %v3800_v8 = vsub.f32 %v6135_v51, %v3663_v53  ;;  %v3814_v51 = vsub.f32 %v6161_v56, %v3669_v60 }
 0x4e8   : > { %5374 = vmatprep.subr.bf16.mxu0 %v6202_v55  ;;  %5290 = vmatprep.subr.bf16.mxu1 %v6202_v55  ;;  %v3746_v25 = vsub.f32 %v6219_v15, %v3745_v23  ;;  %v6238_v28 = vpack.c.bf16 %v3745_v23, %v3738_v21  ;;  %vm3097_vm0 = vcmask 883712  }
 0x4e9   : > { %3021 = vrot.lane.b32.xlu1 %v2940_v45, %s5669_s15  ;;  %v3740_v34 = vand.u32 4294901760, %v3739_v17  ;;  %v3752_v45 = vand.u32 4294901760, %v6243_v29  ;;  %v3793_v17 = vsub.f32 %v6130_v50, %v3660_v52 }
 0x4ea   : > { %3019 = vrot.lane.b32.xlu0 %v2939_v46, %s5669_s15  ;;  %v3747_v38 = vand.u32 4294901760, %v3746_v25  ;;  %s4323_s15 = sshll.u32 %s266_s14, 4  ;;  %s6410_s15 = int_to_ptr.vmem [resolvable:$true] %s4323_s15 }
 0x4eb   : > { %5376 = vmatpush3.bf16.msra.mxu0 %v6202_v55  ;;  %5292 = vmatpush3.bf16.msra.mxu1 %v6202_v55  ;;  %v6265_v46 = vpack.c.bf16 %v3759_v32, %v3752_v45 }
 0x4ec   : > { %5050 = vmatprep.subr.mxu0 %v6225_v13  ;;  %4951 = vmatprep.subr.mxu1 %v6225_v13  ;;  %v6256_v36 = vpack.c.bf16 %v3747_v38, %v3740_v34 }
 0x4ed   : > { %3029 = vrot.lane.b32.xlu1 %v2950_v7, %s5670_s20  ;;  %v3753_v7 = vsub.f32 %v6243_v29, %v3752_v45 }
 0x4ee   : > { %3027 = vrot.lane.b32.xlu0 %v2949_v14, %s5670_s20  ;;  %v2997_v19 = vpop.permute.xlu0 %2996  ;;  %v3760_v14 = vsub.f32 %v6248_v30, %v3759_v32  ;;  %v3807_v32 = vsub.f32 %v6156_v1, %v3666_v57  ;;  %v3828_v1 = vsub.f32 %v6187_v5, %v3675_v9  ;;  %v6319_v5 = vpack.c.bf16 %v6219_v15, %v6214_v54  ;;  %s6417_s20 = scalar_lea.sflag [#allocation3], %s264_s12 }
 0x4ef   : > { %v2993_v22 = vpop.permute.xlu1 %2992  ;;  %v3000_v16 = vmul.f32 %v2997_v19, %v6041_v24  ;;  %5051 = vmatpush3.msra.mxu0 %v6225_v13  ;;  %4952 = vmatpush3.msra.mxu1 %v6225_v13  ;;  %v6325_v9 = vpack.c.bf16 %v3772_v37, %v3765_v33 }
 0x4f0   : > { %v2999_v31 = vmul.f32 %v2993_v22, %v6044_v26  ;;  %5378 = vmatprep.subr.bf16.mxu0 %v6238_v28  ;;  %5294 = vmatprep.subr.bf16.mxu1 %v6256_v36  ;;  %v3761_v41 = vand.u32 4294901760, %v3760_v14  ;;  %v3815_v14 = vand.u32 4294901760, %v3814_v51  ;;  %v3829_v60 = vand.u32 4294901760, %v3828_v1 }
 0x4f1   : > { %3037 = vrot.lane.b32.xlu1 %v2960_v0, %s5671_s11  ;;  %v3766_v0 = vand.u32 4294901760, %v3765_v33 }
 0x4f2   : > { %3035 = vrot.lane.b32.xlu0 %v2959_v40, %s5671_s11  ;;  %s5675_s11 = smov 108   ;;  %v3773_v40 = vand.u32 4294901760, %v3772_v37 }
 0x4f4   : > { %v6271_v43 = vpack.c.bf16 %v3773_v40, %v3766_v0  ;;  %v3774_v42 = vsub.f32 %v3772_v37, %v3773_v40 }
 0x4f5   : > { %3045 = vrot.lane.b32.xlu1 %v2970_v61, %s5672_s16  ;;  %v3754_v61 = vand.u32 4294901760, %v3753_v7  ;;  %v3808_v7 = vand.u32 4294901760, %v3807_v32 }
 0x4f6   : > { %3043 = vrot.lane.b32.xlu0 %v2969_v62, %s5672_s16  ;;  %v3767_v62 = vsub.f32 %v3765_v33, %v3766_v0  ;;  %v3775_v19 = vand.u32 4294901760, %v3774_v42  ;;  %s4424_s16 = sshll.u32 %s5734_s25, 8  ;;  %s5590_s25 = scalar_lea.vmem %s6410_s15, 256 }
 0x4f7   : > { %v3809_v40 = vsub.f32 %v3807_v32, %v3808_v7  ;;  %v6309_v57 = vpack.c.bf16 %v3815_v14, %v3808_v7  ;;  %s6415_s19 = scalar_lea.hbm %s6465_s6, %s4424_s16  ;;  %p5591_p11 = scmp.ne.s32.totalorder %s6410_s15, %s5590_s25 }
 0x4f9   : > { %3053 = vrot.lane.b32.xlu1 %v2980_v10, %s5673_s26  ;;  %v6276_v10 = vpack.c.bf16 %v3761_v41, %v3754_v61  ;;  %v3821_v61 = vsub.f32 %v6182_v4, %v3672_v6  ;;  %v3816_v41 = vsub.f32 %v3814_v51, %v3815_v14  ;;  %v6323_v6 = vpack.c.bf16 %v6248_v30, %v6243_v29  ;;  %p5592_p12 = pnand %p5591_p11, %p5751_p5 }
 0x4fa   : > { %3051 = vrot.lane.b32.xlu0 %v2979_v11, %s5673_s26  ;;  %v3786_v11 = vsub.f32 %v6110_v48, %v3657_v49  ;;  %v3794_v48 = vand.u32 4294901760, %v3793_v17  ;;  %v3801_v49 = vand.u32 4294901760, %v3800_v8  ;;  %s5676_s26 = smov [#allocation2]  }
 0x4fb   : > { %v3822_v56 = vand.u32 4294901760, %v3821_v61  ;;  %v3817_v42 = vand.u32 4294901760, %v3816_v41  ;;  %p5593_p13 = pneg %p5592_p12  ;;  %s5594_s28 = sshll.u32 %s5676_s26, 4  ;;  %s5595_s28 = int_to_ptr.vmem [resolvable:$false] %s5594_s28 }
 0x4fc   : > { %v3787_v21 = vand.u32 4294901760, %v3786_v11  ;;  %v6291_v34 = vpack.c.bf16 %v3801_v49, %v3794_v48  ;;  %v3795_v38 = vsub.f32 %v3793_v17, %v3794_v48  ;;  %v3802_v45 = vsub.f32 %v3800_v8, %v3801_v49  ;;  %s5596_s29 = scalar_lea.vmem %s5595_s28, 512  ;;  %p5597_p0 = scmp.lt.s32.totalorder %s6410_s15, %s5595_s28 }
 0x4fd   : > { %3061 = vrot.lane.b32.xlu1 %v2990_v18, %s5674_s10  ;;  %v3768_v18 = vand.u32 4294901760, %v3767_v62  ;;  %v3810_v62 = vand.u32 4294901760, %v3809_v40  ;;  %v6329_v48 = vpack.c.bf16 %v3800_v8, %v3793_v17  ;;  %v6331_v49 = vpack.c.bf16 %v3814_v51, %v3807_v32  ;;  %p5598_p1 = scmp.lt.s32.totalorder %s5596_s29, %s5590_s25 }
 0x4fe   : > { %3059 = vrot.lane.b32.xlu0 %v2989_v20, %s5674_s10  ;;  %v3780_v20 = vand.u32 4294901760, %v3779_v44  ;;  %v3788_v25 = vsub.f32 %v3786_v11, %v3787_v21  ;;  %v3796_v52 = vand.u32 4294901760, %v3795_v38  ;;  %v3803_v53 = vand.u32 4294901760, %v3802_v45  ;;  %v2902_v38 = vpop.permute.xlu1 %2901 }
 0x4ff   : > { %v6281_v23 = vpack.c.bf16 %v3775_v19, %v3768_v18  ;;  %v6311_v18 = vpack.c.bf16 %v3829_v60, %v3822_v56  ;;  %v3823_v19 = vsub.f32 %v3821_v61, %v3822_v56  ;;  %v2909_v8 = vmul.f32 %v2902_v38, %v6044_v26  ;;  %p5599_p2 = por %p5598_p1, %p5597_p0 }
 0x500   : > { %v3781_v22 = vsub.f32 %v3779_v44, %v3780_v20  ;;  %v6289_v2 = vpack.c.bf16 %v3787_v21, %v3780_v20  ;;  %v6301_v0 = vpack.c.bf16 %v3803_v53, %v3796_v52  ;;  %v3830_v20 = vsub.f32 %v3828_v1, %v3829_v60 }
 0x501   : > { %3069 = vrot.lane.b32.xlu1 %v3000_v16, %s5675_s11  ;;  %v6313_v21 = vpack.c.bf16 %v3817_v42, %v3810_v62  ;;  %p5600_p3 = pnand %p5599_p2, %p5593_p13 }
 0x502   : > { %3067 = vrot.lane.b32.xlu0 %v2999_v31, %s5675_s11  ;;  %v3782_v16 = vand.u32 4294901760, %v3781_v22  ;;  %v3789_v31 = vand.u32 4294901760, %v3788_v25  ;;  %v3824_v22 = vand.u32 4294901760, %v3823_v19  ;;  %v3831_v25 = vand.u32 4294901760, %v3830_v20  ;;  %v2907_v45 = vpop.permute.xlu1 %2906 }
 0x503   : > { %v2910_v17 = vmul.f32 %v2907_v45, %v6041_v24 }
 0x504   : > { %v6296_v50 = vpack.c.bf16 %v3789_v31, %v3782_v16  ;;  %v6315_v4 = vpack.c.bf16 %v3831_v25, %v3824_v22  ;;  %v6327_v16 = vpack.c.bf16 %v3786_v11, %v3779_v44  ;;  %v6333_v31 = vpack.c.bf16 %v3828_v1, %v3821_v61 }
 0x553   : > { %v3006_v52 = vpop.permute.xlu1 %3005 }
 0x554   : > { %v3004_v53 = vpop.permute.xlu0 %3003  ;;  %v3075_v51 = vsel %vm3073_vm8, %v2910_v17, %v3006_v52 }
 0x555   : > { %v3074_v61 = vsel %vm3073_vm8, %v2909_v8, %v3004_v53 }
 0x557   : > { %v3014_v54 = vpop.permute.xlu1 %3013 }
 0x558   : > { %v3012_v15 = vpop.permute.xlu0 %3011  ;;  %v3078_v1 = vsel %vm3076_vm9, %v3075_v51, %v3014_v54 }
 0x559   : > { %v3077_v41 = vsel %vm3076_vm9, %v3074_v61, %v3012_v15 }
 0x55b   : > { %v3022_v7 = vpop.permute.xlu1 %3021 }
 0x55c   : > { %v3020_v14 = vpop.permute.xlu0 %3019  ;;  %v3081_v62 = vsel %vm3079_vm10, %v3078_v1, %v3022_v7 }
 0x55d   : > { %v3080_v56 = vsel %vm3079_vm10, %v3077_v41, %v3020_v14 }
 0x55f   : > { %v3030_v29 = vpop.permute.xlu1 %3029 }
 0x560   : > { %v3028_v30 = vpop.permute.xlu0 %3027  ;;  %v3084_v60 = vsel %vm3082_vm11, %v3081_v62, %v3030_v29 }
 0x561   : > { %v3083_v19 = vsel %vm3082_vm11, %v3080_v56, %v3028_v30 }
 0x563   : > { %v3038_v33 = vpop.permute.xlu1 %3037 }
 0x564   : > { %v3036_v37 = vpop.permute.xlu0 %3035  ;;  %v3087_v24 = vsel %vm3085_vm12, %v3084_v60, %v3038_v33 }
 0x565   : > { %v3086_v26 = vsel %vm3085_vm12, %v3083_v19, %v3036_v37 }
 0x567   : > { %v3046_v44 = vpop.permute.xlu1 %3045 }
 0x568   : > { %v3044_v11 = vpop.permute.xlu0 %3043  ;;  %v3090_v22 = vsel %vm3088_vm13, %v3087_v24, %v3046_v44 }
 0x569   : > { %v3089_v25 = vsel %vm3088_vm13, %v3086_v26, %v3044_v11 }
 0x56b   : > { %v3054_v32 = vpop.permute.xlu1 %3053 }
 0x56c   : > { %v3052_v40 = vpop.permute.xlu0 %3051  ;;  %v3093_v38 = vsel %vm3091_vm14, %v3090_v22, %v3054_v32 }
 0x56d   : > { %v3092_v45 = vsel %vm3091_vm14, %v3089_v25, %v3052_v40 }
 0x56f   : > { %v3062_v42 = vpop.permute.xlu1 %3061 }
 0x570   : > { %v3060_v20 = vpop.permute.xlu0 %3059  ;;  %v3096_v52 = vsel %vm3094_vm15, %v3093_v38, %v3062_v42 }
 0x571   : > { %v3095_v54 = vsel %vm3094_vm15, %v3092_v45, %v3060_v20 }
 0x573   : > { %v3070_v53 = vpop.permute.xlu1 %3069 }
 0x574   : > { %v3099_v15 = vsel %vm3097_vm0, %v3096_v52, %v3070_v53  ;;  %v3068_v7 = vpop.permute.xlu0 %3067 }
 0x575   : > { %v3633_v14 = vsel %vm3628_vm1, %v3099_v15, 0  ;;  %v3098_v29 = vsel %vm3097_vm0, %v3095_v54, %v3068_v7 }
 0x576   : > { %v6337_v17 = vand.u32 4294901760, %v3633_v14  ;;  %v3630_v30 = vsel %vm3628_vm1, %v3098_v29, 0 }
 0x577   : > { %v3715_v33 = vand.u32 4294901760, %v3630_v30 }
 0x578   : > { %v6340_v8 = vsub.f32 %v3633_v14, %v6337_v17 }
 0x579   : > { %v3716_v37 = vsub.f32 %v3630_v30, %v3715_v33 }
 0x57a   : > { %v3727_v44 = vand.u32 4294901760, %v6340_v8 }
 0x57b   : > { %v3717_v11 = vand.u32 4294901760, %v3716_v37 }
 0x57c   : > { %v3728_v32 = vsub.f32 %v6340_v8, %v3727_v44 }
 0x57d   : > { %5052 = vmatprep.mubr.f32.mxu0 %v3717_v11  ;;  %v3718_v51 = vsub.f32 %v3716_v37, %v3717_v11 }
 0x57e   : > { %5053 = vmatmul.mubr.f32.vlgmr.msra.gmra.mrb[6].mxu0 %v3727_v44  ;;  %v3729_v61 = vand.u32 4294901760, %v3728_v32 }
 0x57f   : > { %5380 = vmatpush3.bf16.msra.mxu0 %v6238_v28  ;;  %5085 = vmatprep.mubr.f32.mxu0 %v3715_v33  ;;  %v3719_v40 = vand.u32 4294901760, %v3718_v51  ;;  %v3835_v28 = vsub.f32 %v6208_v12, %v6225_v13 }
 0x580   : > { %5382 = vmatprep.subr.bf16.mxu0 %v6265_v46 }
 0x581   : > { %4953 = vmatprep.mubr.f32.mxu1 %v3719_v40 }
 0x582   : > { %4954 = vmatmul.mubr.f32.vlgmr.msra.gmra.mrb[10].mxu1 %v3729_v61 }
 0x583   : > { %5296 = vmatpush3.bf16.msra.mxu1 %v6256_v36  ;;  %5384 = vmatpush3.bf16.msra.mxu0 %v6265_v46  ;;  %v3836_v36 = vand.u32 4294901760, %v3835_v28 }
 0x584   : > { %4986 = vmatprep.mubr.f32.mxu1 %v3715_v33  ;;  %5298 = vmatprep.subr.bf16.mxu1 %v6276_v10 }
 0x585   : > { %5386 = vmatprep.subr.bf16.mxu0 %v6271_v43  ;;  %v3837_v46 = vsub.f32 %v3835_v28, %v3836_v36 }
 0x587   : > { %5300 = vmatpush3.bf16.msra.mxu1 %v6276_v10  ;;  %5388 = vmatpush3.bf16.msra.mxu0 %v6271_v43  ;;  %v3838_v12 = vand.u32 4294901760, %v3837_v46 }
 0x588   : > { %5302 = vmatprep.subr.bf16.mxu1 %v6281_v23  ;;  %5390 = vmatprep.subr.bf16.mxu0 %v6289_v2 }
 0x58b   : > { %5304 = vmatpush3.bf16.msra.mxu1 %v6281_v23  ;;  %5392 = vmatpush3.bf16.msra.mxu0 %v6289_v2 }
 0x58c   : > { %5306 = vmatprep.subr.bf16.mxu1 %v6296_v50  ;;  %5394 = vmatprep.subr.bf16.mxu0 %v6291_v34 }
 0x58f   : > { %5308 = vmatpush3.bf16.msra.mxu1 %v6296_v50  ;;  %5396 = vmatpush3.bf16.msra.mxu0 %v6291_v34 }
 0x590   : > { %5310 = vmatprep.subr.bf16.mxu1 %v6301_v0  ;;  %5398 = vmatprep.subr.bf16.mxu0 %v6309_v57 }
 0x593   : > { %5312 = vmatpush3.bf16.msra.mxu1 %v6301_v0  ;;  %5400 = vmatpush3.bf16.msra.mxu0 %v6309_v57 }
 0x594   : > { %5314 = vmatprep.subr.bf16.mxu1 %v6313_v21  ;;  %5402 = vmatprep.subr.bf16.mxu0 %v6311_v18 }
 0x597   : > { %5316 = vmatpush3.bf16.msra.mxu1 %v6313_v21  ;;  %5404 = vmatpush3.bf16.msra.mxu0 %v6311_v18 }
 0x598   : > { %5318 = vmatprep.subr.bf16.mxu1 %v6315_v4  ;;  %5083 = vmatprep.subr.mxu0 %v3836_v36 }
 0x59b   : > { %5320 = vmatpush3.bf16.msra.mxu1 %v6315_v4  ;;  %5084 = vmatpush3.msra.mxu0 %v3836_v36 }
 0x59c   : > { %5086 = vmatmul.mubr.f32.vlgmr.msra.gmra.mrb[6].mxu0 %v6337_v17  ;;  %5406 = vmatprep.subr.bf16.mxu0 %v6065_v35 }
 0x59d   : > { %5408 = vmatpush3.bf16.msra.mxu0 %v6065_v35  ;;  %5118 = vmatprep.mubr.f32.mxu0 %v3715_v33 }
 0x59e   : > { %4984 = vmatprep.subr.mxu1 %v3838_v12  ;;  %5410 = vmatprep.subr.bf16.mxu0 %v6075_v39 }
 0x59f   : > { %4985 = vmatpush3.msra.mxu1 %v3838_v12 }
 0x5a0   : > { %4987 = vmatmul.mubr.f32.vlgmr.msra.gmra.mrb[10].mxu1 %v6337_v17  ;;  %5322 = vmatprep.subr.bf16.mxu1 %v6319_v5 }
 0x5a1   : > { %5324 = vmatpush3.bf16.msra.mxu1 %v6319_v5  ;;  %5019 = vmatprep.mubr.f32.mxu1 %v3716_v37 }
 0x5a2   : > { %5412 = vmatpush3.bf16.msra.mxu0 %v6075_v39  ;;  %5326 = vmatprep.subr.bf16.mxu1 %v6323_v6 }
 0x5a3   : > { %5414 = vmatprep.subr.bf16.mxu0 %v6099_v47 }
 0x5a5   : > { %5328 = vmatpush3.bf16.msra.mxu1 %v6323_v6 }
 0x5a6   : > { %5416 = vmatpush3.bf16.msra.mxu0 %v6099_v47  ;;  %5330 = vmatprep.subr.bf16.mxu1 %v6325_v9 }
 0x5a7   : > { %5418 = vmatprep.subr.bf16.mxu0 %v6124_v3 }
 0x5a9   : > { %5332 = vmatpush3.bf16.msra.mxu1 %v6325_v9 }
 0x5aa   : > { %5420 = vmatpush3.bf16.msra.mxu0 %v6124_v3  ;;  %5334 = vmatprep.subr.bf16.mxu1 %v6327_v16 }
 0x5ab   : > { %5422 = vmatprep.subr.bf16.mxu0 %v6150_v27 }
 0x5ad   : > { %5336 = vmatpush3.bf16.msra.mxu1 %v6327_v16 }
 0x5ae   : > { %5424 = vmatpush3.bf16.msra.mxu0 %v6150_v27  ;;  %5338 = vmatprep.subr.bf16.mxu1 %v6329_v48 }
 0x5af   : > { %5426 = vmatprep.subr.bf16.mxu0 %v6176_v63 }
 0x5b1   : > { %5340 = vmatpush3.bf16.msra.mxu1 %v6329_v48 }
 0x5b2   : > { %5428 = vmatpush3.bf16.msra.mxu0 %v6176_v63  ;;  %5342 = vmatprep.subr.bf16.mxu1 %v6331_v49 }
 0x5b3   : > { %5430 = vmatprep.subr.bf16.mxu0 %v6202_v55 }
 0x5b5   : > { %5344 = vmatpush3.bf16.msra.mxu1 %v6331_v49 }
 0x5b6   : > { %5432 = vmatpush3.bf16.msra.mxu0 %v6202_v55  ;;  %5346 = vmatprep.subr.bf16.mxu1 %v6333_v31 }
 0x5b7   : > { %5116 = vmatprep.subr.mxu0 %v6225_v13 }
 0x5b9   : > { %5348 = vmatpush3.bf16.msra.mxu1 %v6333_v31 }
 0x5ba   : > { %5117 = vmatpush3.msra.mxu0 %v6225_v13  ;;  %5017 = vmatprep.subr.mxu1 %v3835_v28 }
 0x5bb   : > { %5119 = vmatmul.mubr.f32.vlgmr.msra.gmra.mrb[6].mxu0 %v6337_v17 }
 0x5bd   : > { %5018 = vmatpush3.msra.mxu1 %v3835_v28 }
 0x5be   : > { %5020 = vmatmul.mubr.f32.vlgmr.msra.gmra.mrb[10].mxu1 %v6340_v8 }
 0x68e   : > { %v5120_v35 = vpop.f32.mrb[6].mxu0 }
 0x68f   : > { %v4296_v39 = vpop.f32.mrb[7].mxu0 }
 0x691   : > { %v5021_v47 = vpop.f32.mrb[10].mxu1 }
 0x692   : > { %v5439_v3 = vadd.f32 %v5021_v47, %v6006_v58  ;;  %v3985_v27 = vpop.f32.mrb[11].mxu1 }
 0x693   : > { %v5441_v63 = vadd.f32 %v3985_v27, %v6008_v59 }
 0x694   : > { %v5440_v55 = vadd.f32 %v5439_v3, %v5120_v35 }
 0x695   : > { %v5442_v13 = vadd.f32 %v5441_v63, %v4296_v39 }
 0x696   : > { %4308 = vst.msk [vmem:[%s266_s14 + $0x8] sm:$0xff] %vm4306_vm2, %v5440_v55 }
 0x697   : > { %4307 = vst.msk [vmem:[%s266_s14] sm:$0xff] %vm4306_vm2, %v5442_v13 }
 0x698   : > { %5603 = shalt.err (!%p5600_p3)
}
 0x699   : > { %s5604_s10 = scalar_lea.hbm %s6415_s19, 256  ;;  %s5608_s13 = scalar_lea.hbm %s6465_s6, 512 }
 0x69a   : > { %p5605_p4 = scmp.ne.s32.totalorder %s6415_s19, %s5604_s10  ;;  %p5609_p9 = scmp.lt.u32.totalorder %s6415_s19, %s6465_s6 }
 0x69b   : > { %p5610_p10 = scmp.lt.u32.totalorder %s5608_s13, %s5604_s10  ;;  %p5612_p12 = scmp.lt.u32.totalorder %s5604_s10, %s6415_s19 }
 0x69c   : > { %p5606_p7 = pnand %p5605_p4, %p5751_p5 }
 0x69d   : > { %p5611_p11 = por %p5610_p10, %p5609_p9 }
 0x69e   : > { %p5607_p8 = pneg %p5606_p7 }
 0x69f   : > { %p5613_p13 = por %p5612_p12, %p5611_p11 }
 0x6a1   : > { %p5614_p0 = pnand %p5613_p13, %p5607_p8 }
 0x6a3   : > { %5617 = shalt.err (!%p5614_p0)
}
 0x6a4   : > { %s5677_s17 = smov 128  }
 0x6a5   : > { %5507 = dma.vmem_to_hbm [thread:$0]  (%p5751_p5), %s6410_s15, 256, %s6415_s19, %s6417_s20, %s5677_s17, %s5677_s17, %s5655_s9  }
 0x6a6 PF: > { %p5513_p1 = scmp.ge.s32.totalorder %s5652_s24, 2  ;;  %s4338_s18 = sand.u32 1, %s5640_s21  }
 0x6a7   : > { %s4339_s25 = scalar_lea.sflag [#allocation3], %s4338_s18 }
 0x6a8   : > { %p5510_p2 = pnand %p5513_p1, %p5755_p6 }
 0x6aa   : > { %5635 = dma.done.wait (!%p5510_p2), %s4339_s25, 256  }
 0x6ab   : > { %5637 = vsyncadd (!%p5510_p2), %s4339_s25, 4294967040  ;;  %p16_p3 = scmp.ge.s32.totalorder %s5738_s27, 4   ;;  %s6468_s21 = smov %s5644_s22 }
 0x6ac   : > { %s6469_s22 = smov %s5648_s23  ;;  %s6470_s23 = smov %s5749_s30 }
 0x6ad   : > { %s6471_s24 = smov %s5738_s27  ;;  %18 = sbr.rel (!%p16_p3) target bundleno = 3 (0x3), region = 85 }
 0x6b4   :  { %4344 = vsyncpa [#allocation3], 1 }
 0x6b5   :  { %4346 = vsyncpa [#allocation3 + $0x1], 1 }

</bundles_post_ra>
